<compile_context>
chip_gen: v5e
topology: v5e:2x2
jax: 0.10.0
libtpu: 0.0.40
codegen_flags: <defaults>
</compile_context>

<pallas_src>
import functools

import jax
import jax.numpy as jnp
import numpy as np
from jax import lax
from jax.experimental import pallas as pl
from jax.experimental.pallas import tpu as pltpu


# 3x3 tap offsets, row-major: t = (dy + 1) * 3 + (dx + 1)  (matches OIHW order).
_TAPS = tuple((dy, dx) for dy in (-1, 0, 1) for dx in (-1, 0, 1))


def _ceil8(v):
    return ((v + 7) // 8) * 8


def _mod(x, m):
    # Power-of-two fast path: VPU bitwise-and instead of integer remainder.
    return jnp.bitwise_and(x, m - 1) if (m & (m - 1)) == 0 else x % m


def _fused_kernel(x_ref, o_ref, buf_ref, rhs_ref, *,
                  C, H, W, CP, OC, OC3, PAD):
    """Three fused 3x3 / stride-1 / pad-value-1.0 convolutions (ones weights).

    x_ref  : (1, C, H*W)          f32 VMEM  this batch's input (real channels only)
    o_ref  : (1, OC3, H*W)        f32 VMEM  lane-dense output
    buf_ref: (CP, PAD + H*W + PAD) f32 VMEM scratch -- 1.0-halo activation buffer
    rhs_ref: (9*CP, H*W)          f32 VMEM  scratch -- tap-stacked matmul RHS
    """
    HW = H * W
    K = 9 * CP

    # 1.0 halo == F.pad(..., value=1).  Filled once per grid step; only the
    # interior lanes [PAD, PAD + HW) are overwritten afterwards.
    buf_ref[...] = jnp.ones(buf_ref.shape, jnp.float32)

    # Horizontal-wrap masks for the flattened layout, hoisted and reused by all
    # three layers.  Vertical out-of-image taps already read 1.0 from the halo.
    col = _mod(lax.broadcasted_iota(jnp.int32, (CP, HW), 1), W)
    mask_l = col >= 1          # lanes valid for taps with dx == -1
    mask_r = col <= W - 2      # lanes valid for taps with dx == +1

    def build_rhs(act, nrows):
        """Store activations into the halo interior, then stack the 9 shifted
        tap windows into rhs_ref (pad-value masks applied while copying)."""
        buf_ref[0:nrows, PAD:PAD + HW] = act       # lane-aligned interior store
        for t, (dy, dx) in enumerate(_TAPS):
            shift = dy * W + dx
            win = buf_ref[:, PAD + shift:PAD + shift + HW]
            if dx == -1:
                win = jnp.where(mask_l, win, 1.0)
            elif dx == 1:
                win = jnp.where(mask_r, win, 1.0)
            rhs_ref[t * CP:(t + 1) * CP, :] = win

    def make_w(rows, real_oc, real_ic):
        """Stacked (rows, 9*CP) weight matrix.  The module forces every conv
        weight to 1.0, so W[o, t*CP + c] = 1 iff (o, c) is a real
        (out-channel, in-channel) pair; padded rows/columns are zero, which is
        what makes the zero-padded / stale channel rows in the halo harmless."""
        r = lax.broadcasted_iota(jnp.int32, (rows, K), 0)
        c = _mod(lax.broadcasted_iota(jnp.int32, (rows, K), 1), CP)
        return jnp.where((r < real_oc) & (c < real_ic),
                         jnp.float32(1.0), jnp.float32(0.0))

    # --- layer 1: C real in-channels -> OC out-channels (padded to CP rows).
    build_rhs(x_ref[0], C)                 # unwritten channel rows hit zero W cols
    a = jnp.dot(make_w(CP, OC, C), rhs_ref[...],
                preferred_element_type=jnp.float32)           # (CP, HW)

    # --- layer 2: OC -> OC.
    build_rhs(a, CP)
    a = jnp.dot(make_w(CP, OC, OC), rhs_ref[...],
                preferred_element_type=jnp.float32)           # (CP, HW)

    # --- layer 3: OC -> OC3, streamed straight into o_ref in 512-lane chunks
    # so the (OC3, HW) f32 result never lives as one register-file-sized value.
    build_rhs(a, CP)
    w3 = make_w(OC3, OC3, OC)
    chunk = 512 if HW % 512 == 0 else HW
    for c0 in range(0, HW, chunk):
        o_ref[0, :, c0:c0 + chunk] = jnp.dot(
            w3, rhs_ref[:, c0:c0 + chunk],
            preferred_element_type=jnp.float32)


@functools.partial(jax.jit, static_argnames=("outchannel", "oc3"))
def mynet_forward(x, outchannel=4, oc3=64):
    """MyNet(inchannel, outchannel) forward (weights forced to ones, no bias)."""
    N, C, H, W = x.shape
    HW = H * W
    CP = _ceil8(max(C, outchannel))      # shared padded channel width (sublanes)
    PAD = 128                            # halo width; keeps the interior lane-aligned
    assert W + 1 <= PAD, "spatial width too large for the fixed halo"
    assert HW % 128 == 0, "flattened spatial size must be lane aligned"
    assert oc3 % 8 == 0
    LEN = PAD + HW + PAD

    # Channels-on-sublanes / flattened-pixels-on-lanes layout.  No channel
    # padding of the input in the wrapper (review item 5): padded channel rows
    # meet zero weight columns inside the kernel.
    x_flat = x.astype(jnp.float32).reshape(N, C, HW)

    kernel = functools.partial(_fused_kernel, C=C, H=H, W=W, CP=CP,
                               OC=outchannel, OC3=oc3, PAD=PAD)

    out_flat = pl.pallas_call(
        kernel,
        out_shape=jax.ShapeDtypeStruct((N, oc3, HW), jnp.float32),
        grid=(N,),
        in_specs=[pl.BlockSpec((1, C, HW), lambda n: (n, 0, 0))],
        out_specs=pl.BlockSpec((1, oc3, HW), lambda n: (n, 0, 0)),
        scratch_shapes=[pltpu.VMEM((CP, LEN), jnp.float32),       # halo buffer
                        pltpu.VMEM((9 * CP, HW), jnp.float32)],   # stacked RHS
        compiler_params=pltpu.CompilerParams(
            # Batches are independent: pipeline them and, on v7x, split them
            # across the two TensorCores.
            dimension_semantics=("parallel",)),
    )(x_flat)

    # Free layout plumbing back to NCHW.
    return out_flat.reshape(N, oc3, H, W)


def _ref_forward_np(x_np, outchannel=4, oc3=64):
    """float64 NumPy reference for the three stacked MyConv2d layers."""
    def conv(a, oc):
        n, c, h, w = a.shape
        wgt = np.ones((oc, c, 3, 3), np.float64)      # weights forced to ones
        ap = np.pad(a, ((0, 0), (0, 0), (1, 1), (1, 1)), constant_values=1.0)
        out = np.zeros((n, oc, h, w), np.float64)
        for fr in range(3):
            for fc in range(3):
                patch = ap[:, :, fr:fr + h, fc:fc + w]
                out += np.einsum('nchw,oc->nohw', patch, wgt[:, :, fr, fc])
        return out
    a = conv(np.asarray(x_np, np.float64), outchannel)
    a = conv(a, outchannel)
    return conv(a, oc3)


if __name__ == "__main__":
    key = jax.random.PRNGKey(0)
    # Same channel/spatial sizes as the module's own example (1, 3, 32, 32);
    # batch 2 exercises the pipelined / parallel grid over N.
    x = jax.random.normal(key, (2, 3, 32, 32), dtype=jnp.float32)

    out = jax.block_until_ready(mynet_forward(x))
    assert out.shape == (2, 64, 32, 32), out.shape
    assert out.dtype == jnp.float32

    ref = _ref_forward_np(np.asarray(x))
    scale = max(1.0, float(np.max(np.abs(ref))))
    err = float(np.max(np.abs(np.asarray(out, dtype=np.float64) - ref)))
    # f32 accumulation-order differences are O(1e-5 * scale); a scaled 1e-3
    # bound still catches any real indexing/masking bug (those are O(scale)).
    if err > 1e-3 * scale:
        raise AssertionError(f"max abs error {err} exceeds {1e-3 * scale}")
    print("KERNEL_OK")
</pallas_src>

<mosaic_0001>
module attributes {stable_mosaic.version = 11 : i64} {
  func.func @_fused_kernel(%arg0: i32, %arg1: memref<1x3x1024xf32, #tpu.memory_space<vmem>>, %arg2: memref<1x64x1024xf32, #tpu.memory_space<vmem>>, %arg3: memref<8x1280xf32, #tpu.memory_space<vmem>>, %arg4: memref<72x1024xf32, #tpu.memory_space<vmem>>) attributes {dimension_semantics = [#tpu.dimension_semantics<parallel>], iteration_bounds = array<i64: 2>, scalar_prefetch = 0 : i64, scratch_operands = 2 : i64, tpu.core_type = #tpu.core_type<tc>, window_params = [{transform_indices = @transform_0, window_bounds = array<i64: 1, 3, 1024>}, {transform_indices = @transform_1, window_bounds = array<i64: 1, 64, 1024>}]} {
    %cst = arith.constant 1.000000e+00 : f32
    %0 = vector.broadcast %cst : f32 to vector<8x1280xf32>
    %c0 = arith.constant 0 : index
    %c0_0 = arith.constant 0 : index
    %1 = vector.load %arg3[%c0, %c0_0] : memref<8x1280xf32, #tpu.memory_space<vmem>>, vector<8x1280xf32>
    tpu.vector_store %arg3[%c0, %c0_0], %0 {strides = array<i32>} : memref<8x1280xf32, #tpu.memory_space<vmem>>, vector<8x1280xf32>,
    %2 = tpu.iota {dimensions = array<i32: 1>} : vector<8x1024xi32>
    %c31_i32 = arith.constant 31 : i32
    %3 = vector.broadcast %c31_i32 : i32 to vector<8x1024xi32>
    %4 = arith.andi %2, %3 : vector<8x1024xi32>
    %c1_i32 = arith.constant 1 : i32
    %5 = vector.broadcast %c1_i32 : i32 to vector<8x1024xi32>
    %6 = arith.cmpi sge, %4, %5 : vector<8x1024xi32>
    %c30_i32 = arith.constant 30 : i32
    %7 = vector.broadcast %c30_i32 : i32 to vector<8x1024xi32>
    %8 = arith.cmpi sle, %4, %7 : vector<8x1024xi32>
    %c0_1 = arith.constant 0 : index
    %c0_2 = arith.constant 0 : index
    %c0_3 = arith.constant 0 : index
    %9 = vector.load %arg1[%c0_1, %c0_2, %c0_3] : memref<1x3x1024xf32, #tpu.memory_space<vmem>>, vector<1x3x1024xf32>
    %10 = vector.shape_cast %9 : vector<1x3x1024xf32> to vector<3x1024xf32>
    %c0_4 = arith.constant 0 : index
    %c128 = arith.constant 128 : index
    %11 = vector.load %arg3[%c0_4, %c128] : memref<8x1280xf32, #tpu.memory_space<vmem>>, vector<3x1024xf32>
    tpu.vector_store %arg3[%c0_4, %c128], %10 {strides = array<i32>} : memref<8x1280xf32, #tpu.memory_space<vmem>>, vector<3x1024xf32>,
    %c0_5 = arith.constant 0 : index
    %c95 = arith.constant 95 : index
    %12 = vector.load %arg3[%c0_5, %c95] : memref<8x1280xf32, #tpu.memory_space<vmem>>, vector<8x1024xf32>
    %cst_6 = arith.constant 1.000000e+00 : f32
    %13 = vector.broadcast %cst_6 : f32 to vector<8x1024xf32>
    %14 = arith.select %6, %12, %13 : vector<8x1024xi1>, vector<8x1024xf32>
    %c0_7 = arith.constant 0 : index
    %c0_8 = arith.constant 0 : index
    %15 = vector.load %arg4[%c0_7, %c0_8] : memref<72x1024xf32, #tpu.memory_space<vmem>>, vector<8x1024xf32>
    tpu.vector_store %arg4[%c0_7, %c0_8], %14 {strides = array<i32>} : memref<72x1024xf32, #tpu.memory_space<vmem>>, vector<8x1024xf32>,
    %c0_9 = arith.constant 0 : index
    %c96 = arith.constant 96 : index
    %16 = vector.load %arg3[%c0_9, %c96] : memref<8x1280xf32, #tpu.memory_space<vmem>>, vector<8x1024xf32>
    %c8 = arith.constant 8 : index
    %c0_10 = arith.constant 0 : index
    %17 = vector.load %arg4[%c8, %c0_10] : memref<72x1024xf32, #tpu.memory_space<vmem>>, vector<8x1024xf32>
    tpu.vector_store %arg4[%c8, %c0_10], %16 {strides = array<i32>} : memref<72x1024xf32, #tpu.memory_space<vmem>>, vector<8x1024xf32>,
    %c0_11 = arith.constant 0 : index
    %c97 = arith.constant 97 : index
    %18 = vector.load %arg3[%c0_11, %c97] : memref<8x1280xf32, #tpu.memory_space<vmem>>, vector<8x1024xf32>
    %cst_12 = arith.constant 1.000000e+00 : f32
    %19 = vector.broadcast %cst_12 : f32 to vector<8x1024xf32>
    %20 = arith.select %8, %18, %19 : vector<8x1024xi1>, vector<8x1024xf32>
    %c16 = arith.constant 16 : index
    %c0_13 = arith.constant 0 : index
    %21 = vector.load %arg4[%c16, %c0_13] : memref<72x1024xf32, #tpu.memory_space<vmem>>, vector<8x1024xf32>
    tpu.vector_store %arg4[%c16, %c0_13], %20 {strides = array<i32>} : memref<72x1024xf32, #tpu.memory_space<vmem>>, vector<8x1024xf32>,
    %c0_14 = arith.constant 0 : index
    %c127 = arith.constant 127 : index
    %22 = vector.load %arg3[%c0_14, %c127] : memref<8x1280xf32, #tpu.memory_space<vmem>>, vector<8x1024xf32>
    %cst_15 = arith.constant 1.000000e+00 : f32
    %23 = vector.broadcast %cst_15 : f32 to vector<8x1024xf32>
    %24 = arith.select %6, %22, %23 : vector<8x1024xi1>, vector<8x1024xf32>
    %c24 = arith.constant 24 : index
    %c0_16 = arith.constant 0 : index
    %25 = vector.load %arg4[%c24, %c0_16] : memref<72x1024xf32, #tpu.memory_space<vmem>>, vector<8x1024xf32>
    tpu.vector_store %arg4[%c24, %c0_16], %24 {strides = array<i32>} : memref<72x1024xf32, #tpu.memory_space<vmem>>, vector<8x1024xf32>,
    %c0_17 = arith.constant 0 : index
    %c128_18 = arith.constant 128 : index
    %26 = vector.load %arg3[%c0_17, %c128_18] : memref<8x1280xf32, #tpu.memory_space<vmem>>, vector<8x1024xf32>
    %c32 = arith.constant 32 : index
    %c0_19 = arith.constant 0 : index
    %27 = vector.load %arg4[%c32, %c0_19] : memref<72x1024xf32, #tpu.memory_space<vmem>>, vector<8x1024xf32>
    tpu.vector_store %arg4[%c32, %c0_19], %26 {strides = array<i32>} : memref<72x1024xf32, #tpu.memory_space<vmem>>, vector<8x1024xf32>,
    %c0_20 = arith.constant 0 : index
    %c129 = arith.constant 129 : index
    %28 = vector.load %arg3[%c0_20, %c129] : memref<8x1280xf32, #tpu.memory_space<vmem>>, vector<8x1024xf32>
    %cst_21 = arith.constant 1.000000e+00 : f32
    %29 = vector.broadcast %cst_21 : f32 to vector<8x1024xf32>
    %30 = arith.select %8, %28, %29 : vector<8x1024xi1>, vector<8x1024xf32>
    %c40 = arith.constant 40 : index
    %c0_22 = arith.constant 0 : index
    %31 = vector.load %arg4[%c40, %c0_22] : memref<72x1024xf32, #tpu.memory_space<vmem>>, vector<8x1024xf32>
    tpu.vector_store %arg4[%c40, %c0_22], %30 {strides = array<i32>} : memref<72x1024xf32, #tpu.memory_space<vmem>>, vector<8x1024xf32>,
    %c0_23 = arith.constant 0 : index
    %c159 = arith.constant 159 : index
    %32 = vector.load %arg3[%c0_23, %c159] : memref<8x1280xf32, #tpu.memory_space<vmem>>, vector<8x1024xf32>
    %cst_24 = arith.constant 1.000000e+00 : f32
    %33 = vector.broadcast %cst_24 : f32 to vector<8x1024xf32>
    %34 = arith.select %6, %32, %33 : vector<8x1024xi1>, vector<8x1024xf32>
    %c48 = arith.constant 48 : index
    %c0_25 = arith.constant 0 : index
    %35 = vector.load %arg4[%c48, %c0_25] : memref<72x1024xf32, #tpu.memory_space<vmem>>, vector<8x1024xf32>
    tpu.vector_store %arg4[%c48, %c0_25], %34 {strides = array<i32>} : memref<72x1024xf32, #tpu.memory_space<vmem>>, vector<8x1024xf32>,
    %c0_26 = arith.constant 0 : index
    %c160 = arith.constant 160 : index
    %36 = vector.load %arg3[%c0_26, %c160] : memref<8x1280xf32, #tpu.memory_space<vmem>>, vector<8x1024xf32>
    %c56 = arith.constant 56 : index
    %c0_27 = arith.constant 0 : index
    %37 = vector.load %arg4[%c56, %c0_27] : memref<72x1024xf32, #tpu.memory_space<vmem>>, vector<8x1024xf32>
    tpu.vector_store %arg4[%c56, %c0_27], %36 {strides = array<i32>} : memref<72x1024xf32, #tpu.memory_space<vmem>>, vector<8x1024xf32>,
    %c0_28 = arith.constant 0 : index
    %c161 = arith.constant 161 : index
    %38 = vector.load %arg3[%c0_28, %c161] : memref<8x1280xf32, #tpu.memory_space<vmem>>, vector<8x1024xf32>
    %cst_29 = arith.constant 1.000000e+00 : f32
    %39 = vector.broadcast %cst_29 : f32 to vector<8x1024xf32>
    %40 = arith.select %8, %38, %39 : vector<8x1024xi1>, vector<8x1024xf32>
    %c64 = arith.constant 64 : index
    %c0_30 = arith.constant 0 : index
    %41 = vector.load %arg4[%c64, %c0_30] : memref<72x1024xf32, #tpu.memory_space<vmem>>, vector<8x1024xf32>
    tpu.vector_store %arg4[%c64, %c0_30], %40 {strides = array<i32>} : memref<72x1024xf32, #tpu.memory_space<vmem>>, vector<8x1024xf32>,
    %42 = tpu.iota {dimensions = array<i32: 0>} : vector<8x72xi32>
    %43 = tpu.iota {dimensions = array<i32: 1>} : vector<8x72xi32>
    %c7_i32 = arith.constant 7 : i32
    %44 = vector.broadcast %c7_i32 : i32 to vector<8x72xi32>
    %45 = arith.andi %43, %44 : vector<8x72xi32>
    %c4_i32 = arith.constant 4 : i32
    %46 = vector.broadcast %c4_i32 : i32 to vector<8x72xi32>
    %47 = arith.cmpi slt, %42, %46 : vector<8x72xi32>
    %c3_i32 = arith.constant 3 : i32
    %48 = vector.broadcast %c3_i32 : i32 to vector<8x72xi32>
    %49 = arith.cmpi slt, %45, %48 : vector<8x72xi32>
    %50 = arith.andi %47, %49 : vector<8x72xi1>
    %cst_31 = arith.constant 1.000000e+00 : f32
    %cst_32 = arith.constant 0.000000e+00 : f32
    %51 = vector.broadcast %cst_31 : f32 to vector<8x72xf32>
    %52 = vector.broadcast %cst_32 : f32 to vector<8x72xf32>
    %53 = arith.select %50, %51, %52 : vector<8x72xi1>, vector<8x72xf32>
    %c0_33 = arith.constant 0 : index
    %c0_34 = arith.constant 0 : index
    %54 = vector.load %arg4[%c0_33, %c0_34] : memref<72x1024xf32, #tpu.memory_space<vmem>>, vector<72x1024xf32>
    %cst_35 = arith.constant dense<0.000000e+00> : vector<8x1024xf32>
    %55 = tpu.matmul %53, %54, %cst_35 {dimension_numbers = #tpu.dot_dimension_numbers<[1], [0], [0], [1], [0, 0, 1, 1], [], []>} : vector<8x72xf32>, vector<72x1024xf32>, vector<8x1024xf32> -> vector<8x1024xf32>
    %c0_36 = arith.constant 0 : index
    %c128_37 = arith.constant 128 : index
    %56 = vector.load %arg3[%c0_36, %c128_37] : memref<8x1280xf32, #tpu.memory_space<vmem>>, vector<8x1024xf32>
    tpu.vector_store %arg3[%c0_36, %c128_37], %55 {strides = array<i32>} : memref<8x1280xf32, #tpu.memory_space<vmem>>, vector<8x1024xf32>,
    %c0_38 = arith.constant 0 : index
    %c95_39 = arith.constant 95 : index
    %57 = vector.load %arg3[%c0_38, %c95_39] : memref<8x1280xf32, #tpu.memory_space<vmem>>, vector<8x1024xf32>
    %cst_40 = arith.constant 1.000000e+00 : f32
    %58 = vector.broadcast %cst_40 : f32 to vector<8x1024xf32>
    %59 = arith.select %6, %57, %58 : vector<8x1024xi1>, vector<8x1024xf32>
    %c0_41 = arith.constant 0 : index
    %c0_42 = arith.constant 0 : index
    %60 = vector.load %arg4[%c0_41, %c0_42] : memref<72x1024xf32, #tpu.memory_space<vmem>>, vector<8x1024xf32>
    tpu.vector_store %arg4[%c0_41, %c0_42], %59 {strides = array<i32>} : memref<72x1024xf32, #tpu.memory_space<vmem>>, vector<8x1024xf32>,
    %c0_43 = arith.constant 0 : index
    %c96_44 = arith.constant 96 : index
    %61 = vector.load %arg3[%c0_43, %c96_44] : memref<8x1280xf32, #tpu.memory_space<vmem>>, vector<8x1024xf32>
    %c8_45 = arith.constant 8 : index
    %c0_46 = arith.constant 0 : index
    %62 = vector.load %arg4[%c8_45, %c0_46] : memref<72x1024xf32, #tpu.memory_space<vmem>>, vector<8x1024xf32>
    tpu.vector_store %arg4[%c8_45, %c0_46], %61 {strides = array<i32>} : memref<72x1024xf32, #tpu.memory_space<vmem>>, vector<8x1024xf32>,
    %c0_47 = arith.constant 0 : index
    %c97_48 = arith.constant 97 : index
    %63 = vector.load %arg3[%c0_47, %c97_48] : memref<8x1280xf32, #tpu.memory_space<vmem>>, vector<8x1024xf32>
    %cst_49 = arith.constant 1.000000e+00 : f32
    %64 = vector.broadcast %cst_49 : f32 to vector<8x1024xf32>
    %65 = arith.select %8, %63, %64 : vector<8x1024xi1>, vector<8x1024xf32>
    %c16_50 = arith.constant 16 : index
    %c0_51 = arith.constant 0 : index
    %66 = vector.load %arg4[%c16_50, %c0_51] : memref<72x1024xf32, #tpu.memory_space<vmem>>, vector<8x1024xf32>
    tpu.vector_store %arg4[%c16_50, %c0_51], %65 {strides = array<i32>} : memref<72x1024xf32, #tpu.memory_space<vmem>>, vector<8x1024xf32>,
    %c0_52 = arith.constant 0 : index
    %c127_53 = arith.constant 127 : index
    %67 = vector.load %arg3[%c0_52, %c127_53] : memref<8x1280xf32, #tpu.memory_space<vmem>>, vector<8x1024xf32>
    %cst_54 = arith.constant 1.000000e+00 : f32
    %68 = vector.broadcast %cst_54 : f32 to vector<8x1024xf32>
    %69 = arith.select %6, %67, %68 : vector<8x1024xi1>, vector<8x1024xf32>
    %c24_55 = arith.constant 24 : index
    %c0_56 = arith.constant 0 : index
    %70 = vector.load %arg4[%c24_55, %c0_56] : memref<72x1024xf32, #tpu.memory_space<vmem>>, vector<8x1024xf32>
    tpu.vector_store %arg4[%c24_55, %c0_56], %69 {strides = array<i32>} : memref<72x1024xf32, #tpu.memory_space<vmem>>, vector<8x1024xf32>,
    %c0_57 = arith.constant 0 : index
    %c128_58 = arith.constant 128 : index
    %71 = vector.load %arg3[%c0_57, %c128_58] : memref<8x1280xf32, #tpu.memory_space<vmem>>, vector<8x1024xf32>
    %c32_59 = arith.constant 32 : index
    %c0_60 = arith.constant 0 : index
    %72 = vector.load %arg4[%c32_59, %c0_60] : memref<72x1024xf32, #tpu.memory_space<vmem>>, vector<8x1024xf32>
    tpu.vector_store %arg4[%c32_59, %c0_60], %71 {strides = array<i32>} : memref<72x1024xf32, #tpu.memory_space<vmem>>, vector<8x1024xf32>,
    %c0_61 = arith.constant 0 : index
    %c129_62 = arith.constant 129 : index
    %73 = vector.load %arg3[%c0_61, %c129_62] : memref<8x1280xf32, #tpu.memory_space<vmem>>, vector<8x1024xf32>
    %cst_63 = arith.constant 1.000000e+00 : f32
    %74 = vector.broadcast %cst_63 : f32 to vector<8x1024xf32>
    %75 = arith.select %8, %73, %74 : vector<8x1024xi1>, vector<8x1024xf32>
    %c40_64 = arith.constant 40 : index
    %c0_65 = arith.constant 0 : index
    %76 = vector.load %arg4[%c40_64, %c0_65] : memref<72x1024xf32, #tpu.memory_space<vmem>>, vector<8x1024xf32>
    tpu.vector_store %arg4[%c40_64, %c0_65], %75 {strides = array<i32>} : memref<72x1024xf32, #tpu.memory_space<vmem>>, vector<8x1024xf32>,
    %c0_66 = arith.constant 0 : index
    %c159_67 = arith.constant 159 : index
    %77 = vector.load %arg3[%c0_66, %c159_67] : memref<8x1280xf32, #tpu.memory_space<vmem>>, vector<8x1024xf32>
    %cst_68 = arith.constant 1.000000e+00 : f32
    %78 = vector.broadcast %cst_68 : f32 to vector<8x1024xf32>
    %79 = arith.select %6, %77, %78 : vector<8x1024xi1>, vector<8x1024xf32>
    %c48_69 = arith.constant 48 : index
    %c0_70 = arith.constant 0 : index
    %80 = vector.load %arg4[%c48_69, %c0_70] : memref<72x1024xf32, #tpu.memory_space<vmem>>, vector<8x1024xf32>
    tpu.vector_store %arg4[%c48_69, %c0_70], %79 {strides = array<i32>} : memref<72x1024xf32, #tpu.memory_space<vmem>>, vector<8x1024xf32>,
    %c0_71 = arith.constant 0 : index
    %c160_72 = arith.constant 160 : index
    %81 = vector.load %arg3[%c0_71, %c160_72] : memref<8x1280xf32, #tpu.memory_space<vmem>>, vector<8x1024xf32>
    %c56_73 = arith.constant 56 : index
    %c0_74 = arith.constant 0 : index
    %82 = vector.load %arg4[%c56_73, %c0_74] : memref<72x1024xf32, #tpu.memory_space<vmem>>, vector<8x1024xf32>
    tpu.vector_store %arg4[%c56_73, %c0_74], %81 {strides = array<i32>} : memref<72x1024xf32, #tpu.memory_space<vmem>>, vector<8x1024xf32>,
    %c0_75 = arith.constant 0 : index
    %c161_76 = arith.constant 161 : index
    %83 = vector.load %arg3[%c0_75, %c161_76] : memref<8x1280xf32, #tpu.memory_space<vmem>>, vector<8x1024xf32>
    %cst_77 = arith.constant 1.000000e+00 : f32
    %84 = vector.broadcast %cst_77 : f32 to vector<8x1024xf32>
    %85 = arith.select %8, %83, %84 : vector<8x1024xi1>, vector<8x1024xf32>
    %c64_78 = arith.constant 64 : index
    %c0_79 = arith.constant 0 : index
    %86 = vector.load %arg4[%c64_78, %c0_79] : memref<72x1024xf32, #tpu.memory_space<vmem>>, vector<8x1024xf32>
    tpu.vector_store %arg4[%c64_78, %c0_79], %85 {strides = array<i32>} : memref<72x1024xf32, #tpu.memory_space<vmem>>, vector<8x1024xf32>,
    %87 = tpu.iota {dimensions = array<i32: 0>} : vector<8x72xi32>
    %88 = tpu.iota {dimensions = array<i32: 1>} : vector<8x72xi32>
    %c7_i32_80 = arith.constant 7 : i32
    %89 = vector.broadcast %c7_i32_80 : i32 to vector<8x72xi32>
    %90 = arith.andi %88, %89 : vector<8x72xi32>
    %c4_i32_81 = arith.constant 4 : i32
    %91 = vector.broadcast %c4_i32_81 : i32 to vector<8x72xi32>
    %92 = arith.cmpi slt, %87, %91 : vector<8x72xi32>
    %c4_i32_82 = arith.constant 4 : i32
    %93 = vector.broadcast %c4_i32_82 : i32 to vector<8x72xi32>
    %94 = arith.cmpi slt, %90, %93 : vector<8x72xi32>
    %95 = arith.andi %92, %94 : vector<8x72xi1>
    %cst_83 = arith.constant 1.000000e+00 : f32
    %cst_84 = arith.constant 0.000000e+00 : f32
    %96 = vector.broadcast %cst_83 : f32 to vector<8x72xf32>
    %97 = vector.broadcast %cst_84 : f32 to vector<8x72xf32>
    %98 = arith.select %95, %96, %97 : vector<8x72xi1>, vector<8x72xf32>
    %c0_85 = arith.constant 0 : index
    %c0_86 = arith.constant 0 : index
    %99 = vector.load %arg4[%c0_85, %c0_86] : memref<72x1024xf32, #tpu.memory_space<vmem>>, vector<72x1024xf32>
    %cst_87 = arith.constant dense<0.000000e+00> : vector<8x1024xf32>
    %100 = tpu.matmul %98, %99, %cst_87 {dimension_numbers = #tpu.dot_dimension_numbers<[1], [0], [0], [1], [0, 0, 1, 1], [], []>} : vector<8x72xf32>, vector<72x1024xf32>, vector<8x1024xf32> -> vector<8x1024xf32>
    %c0_88 = arith.constant 0 : index
    %c128_89 = arith.constant 128 : index
    %101 = vector.load %arg3[%c0_88, %c128_89] : memref<8x1280xf32, #tpu.memory_space<vmem>>, vector<8x1024xf32>
    tpu.vector_store %arg3[%c0_88, %c128_89], %100 {strides = array<i32>} : memref<8x1280xf32, #tpu.memory_space<vmem>>, vector<8x1024xf32>,
    %c0_90 = arith.constant 0 : index
    %c95_91 = arith.constant 95 : index
    %102 = vector.load %arg3[%c0_90, %c95_91] : memref<8x1280xf32, #tpu.memory_space<vmem>>, vector<8x1024xf32>
    %cst_92 = arith.constant 1.000000e+00 : f32
    %103 = vector.broadcast %cst_92 : f32 to vector<8x1024xf32>
    %104 = arith.select %6, %102, %103 : vector<8x1024xi1>, vector<8x1024xf32>
    %c0_93 = arith.constant 0 : index
    %c0_94 = arith.constant 0 : index
    %105 = vector.load %arg4[%c0_93, %c0_94] : memref<72x1024xf32, #tpu.memory_space<vmem>>, vector<8x1024xf32>
    tpu.vector_store %arg4[%c0_93, %c0_94], %104 {strides = array<i32>} : memref<72x1024xf32, #tpu.memory_space<vmem>>, vector<8x1024xf32>,
    %c0_95 = arith.constant 0 : index
    %c96_96 = arith.constant 96 : index
    %106 = vector.load %arg3[%c0_95, %c96_96] : memref<8x1280xf32, #tpu.memory_space<vmem>>, vector<8x1024xf32>
    %c8_97 = arith.constant 8 : index
    %c0_98 = arith.constant 0 : index
    %107 = vector.load %arg4[%c8_97, %c0_98] : memref<72x1024xf32, #tpu.memory_space<vmem>>, vector<8x1024xf32>
    tpu.vector_store %arg4[%c8_97, %c0_98], %106 {strides = array<i32>} : memref<72x1024xf32, #tpu.memory_space<vmem>>, vector<8x1024xf32>,
    %c0_99 = arith.constant 0 : index
    %c97_100 = arith.constant 97 : index
    %108 = vector.load %arg3[%c0_99, %c97_100] : memref<8x1280xf32, #tpu.memory_space<vmem>>, vector<8x1024xf32>
    %cst_101 = arith.constant 1.000000e+00 : f32
    %109 = vector.broadcast %cst_101 : f32 to vector<8x1024xf32>
    %110 = arith.select %8, %108, %109 : vector<8x1024xi1>, vector<8x1024xf32>
    %c16_102 = arith.constant 16 : index
    %c0_103 = arith.constant 0 : index
    %111 = vector.load %arg4[%c16_102, %c0_103] : memref<72x1024xf32, #tpu.memory_space<vmem>>, vector<8x1024xf32>
    tpu.vector_store %arg4[%c16_102, %c0_103], %110 {strides = array<i32>} : memref<72x1024xf32, #tpu.memory_space<vmem>>, vector<8x1024xf32>,
    %c0_104 = arith.constant 0 : index
    %c127_105 = arith.constant 127 : index
    %112 = vector.load %arg3[%c0_104, %c127_105] : memref<8x1280xf32, #tpu.memory_space<vmem>>, vector<8x1024xf32>
    %cst_106 = arith.constant 1.000000e+00 : f32
    %113 = vector.broadcast %cst_106 : f32 to vector<8x1024xf32>
    %114 = arith.select %6, %112, %113 : vector<8x1024xi1>, vector<8x1024xf32>
    %c24_107 = arith.constant 24 : index
    %c0_108 = arith.constant 0 : index
    %115 = vector.load %arg4[%c24_107, %c0_108] : memref<72x1024xf32, #tpu.memory_space<vmem>>, vector<8x1024xf32>
    tpu.vector_store %arg4[%c24_107, %c0_108], %114 {strides = array<i32>} : memref<72x1024xf32, #tpu.memory_space<vmem>>, vector<8x1024xf32>,
    %c0_109 = arith.constant 0 : index
    %c128_110 = arith.constant 128 : index
    %116 = vector.load %arg3[%c0_109, %c128_110] : memref<8x1280xf32, #tpu.memory_space<vmem>>, vector<8x1024xf32>
    %c32_111 = arith.constant 32 : index
    %c0_112 = arith.constant 0 : index
    %117 = vector.load %arg4[%c32_111, %c0_112] : memref<72x1024xf32, #tpu.memory_space<vmem>>, vector<8x1024xf32>
    tpu.vector_store %arg4[%c32_111, %c0_112], %116 {strides = array<i32>} : memref<72x1024xf32, #tpu.memory_space<vmem>>, vector<8x1024xf32>,
    %c0_113 = arith.constant 0 : index
    %c129_114 = arith.constant 129 : index
    %118 = vector.load %arg3[%c0_113, %c129_114] : memref<8x1280xf32, #tpu.memory_space<vmem>>, vector<8x1024xf32>
    %cst_115 = arith.constant 1.000000e+00 : f32
    %119 = vector.broadcast %cst_115 : f32 to vector<8x1024xf32>
    %120 = arith.select %8, %118, %119 : vector<8x1024xi1>, vector<8x1024xf32>
    %c40_116 = arith.constant 40 : index
    %c0_117 = arith.constant 0 : index
    %121 = vector.load %arg4[%c40_116, %c0_117] : memref<72x1024xf32, #tpu.memory_space<vmem>>, vector<8x1024xf32>
    tpu.vector_store %arg4[%c40_116, %c0_117], %120 {strides = array<i32>} : memref<72x1024xf32, #tpu.memory_space<vmem>>, vector<8x1024xf32>,
    %c0_118 = arith.constant 0 : index
    %c159_119 = arith.constant 159 : index
    %122 = vector.load %arg3[%c0_118, %c159_119] : memref<8x1280xf32, #tpu.memory_space<vmem>>, vector<8x1024xf32>
    %cst_120 = arith.constant 1.000000e+00 : f32
    %123 = vector.broadcast %cst_120 : f32 to vector<8x1024xf32>
    %124 = arith.select %6, %122, %123 : vector<8x1024xi1>, vector<8x1024xf32>
    %c48_121 = arith.constant 48 : index
    %c0_122 = arith.constant 0 : index
    %125 = vector.load %arg4[%c48_121, %c0_122] : memref<72x1024xf32, #tpu.memory_space<vmem>>, vector<8x1024xf32>
    tpu.vector_store %arg4[%c48_121, %c0_122], %124 {strides = array<i32>} : memref<72x1024xf32, #tpu.memory_space<vmem>>, vector<8x1024xf32>,
    %c0_123 = arith.constant 0 : index
    %c160_124 = arith.constant 160 : index
    %126 = vector.load %arg3[%c0_123, %c160_124] : memref<8x1280xf32, #tpu.memory_space<vmem>>, vector<8x1024xf32>
    %c56_125 = arith.constant 56 : index
    %c0_126 = arith.constant 0 : index
    %127 = vector.load %arg4[%c56_125, %c0_126] : memref<72x1024xf32, #tpu.memory_space<vmem>>, vector<8x1024xf32>
    tpu.vector_store %arg4[%c56_125, %c0_126], %126 {strides = array<i32>} : memref<72x1024xf32, #tpu.memory_space<vmem>>, vector<8x1024xf32>,
    %c0_127 = arith.constant 0 : index
    %c161_128 = arith.constant 161 : index
    %128 = vector.load %arg3[%c0_127, %c161_128] : memref<8x1280xf32, #tpu.memory_space<vmem>>, vector<8x1024xf32>
    %cst_129 = arith.constant 1.000000e+00 : f32
    %129 = vector.broadcast %cst_129 : f32 to vector<8x1024xf32>
    %130 = arith.select %8, %128, %129 : vector<8x1024xi1>, vector<8x1024xf32>
    %c64_130 = arith.constant 64 : index
    %c0_131 = arith.constant 0 : index
    %131 = vector.load %arg4[%c64_130, %c0_131] : memref<72x1024xf32, #tpu.memory_space<vmem>>, vector<8x1024xf32>
    tpu.vector_store %arg4[%c64_130, %c0_131], %130 {strides = array<i32>} : memref<72x1024xf32, #tpu.memory_space<vmem>>, vector<8x1024xf32>,
    %132 = tpu.iota {dimensions = array<i32: 0>} : vector<64x72xi32>
    %133 = tpu.iota {dimensions = array<i32: 1>} : vector<64x72xi32>
    %c7_i32_132 = arith.constant 7 : i32
    %134 = vector.broadcast %c7_i32_132 : i32 to vector<64x72xi32>
    %135 = arith.andi %133, %134 : vector<64x72xi32>
    %c64_i32 = arith.constant 64 : i32
    %136 = vector.broadcast %c64_i32 : i32 to vector<64x72xi32>
    %137 = arith.cmpi slt, %132, %136 : vector<64x72xi32>
    %c4_i32_133 = arith.constant 4 : i32
    %138 = vector.broadcast %c4_i32_133 : i32 to vector<64x72xi32>
    %139 = arith.cmpi slt, %135, %138 : vector<64x72xi32>
    %140 = arith.andi %137, %139 : vector<64x72xi1>
    %cst_134 = arith.constant 1.000000e+00 : f32
    %cst_135 = arith.constant 0.000000e+00 : f32
    %141 = vector.broadcast %cst_134 : f32 to vector<64x72xf32>
    %142 = vector.broadcast %cst_135 : f32 to vector<64x72xf32>
    %143 = arith.select %140, %141, %142 : vector<64x72xi1>, vector<64x72xf32>
    %c0_136 = arith.constant 0 : index
    %c0_137 = arith.constant 0 : index
    %144 = vector.load %arg4[%c0_136, %c0_137] : memref<72x1024xf32, #tpu.memory_space<vmem>>, vector<72x512xf32>
    %cst_138 = arith.constant dense<0.000000e+00> : vector<64x512xf32>
    %145 = tpu.matmul %143, %144, %cst_138 {dimension_numbers = #tpu.dot_dimension_numbers<[1], [0], [0], [1], [0, 0, 1, 1], [], []>} : vector<64x72xf32>, vector<72x512xf32>, vector<64x512xf32> -> vector<64x512xf32>
    %c0_139 = arith.constant 0 : index
    %c0_140 = arith.constant 0 : index
    %c0_141 = arith.constant 0 : index
    %146 = vector.load %arg2[%c0_139, %c0_140, %c0_141] : memref<1x64x1024xf32, #tpu.memory_space<vmem>>, vector<1x64x512xf32>
    %147 = vector.shape_cast %146 : vector<1x64x512xf32> to vector<64x512xf32>
    %148 = vector.shape_cast %145 : vector<64x512xf32> to vector<1x64x512xf32>
    tpu.vector_store %arg2[%c0_139, %c0_140, %c0_141], %148 {strides = array<i32>} : memref<1x64x1024xf32, #tpu.memory_space<vmem>>, vector<1x64x512xf32>,
    %c0_142 = arith.constant 0 : index
    %c512 = arith.constant 512 : index
    %149 = vector.load %arg4[%c0_142, %c512] : memref<72x1024xf32, #tpu.memory_space<vmem>>, vector<72x512xf32>
    %cst_143 = arith.constant dense<0.000000e+00> : vector<64x512xf32>
    %150 = tpu.matmul %143, %149, %cst_143 {dimension_numbers = #tpu.dot_dimension_numbers<[1], [0], [0], [1], [0, 0, 1, 1], [], []>} : vector<64x72xf32>, vector<72x512xf32>, vector<64x512xf32> -> vector<64x512xf32>
    %c0_144 = arith.constant 0 : index
    %c0_145 = arith.constant 0 : index
    %c512_146 = arith.constant 512 : index
    %151 = vector.load %arg2[%c0_144, %c0_145, %c512_146] : memref<1x64x1024xf32, #tpu.memory_space<vmem>>, vector<1x64x512xf32>
    %152 = vector.shape_cast %151 : vector<1x64x512xf32> to vector<64x512xf32>
    %153 = vector.shape_cast %150 : vector<64x512xf32> to vector<1x64x512xf32>
    tpu.vector_store %arg2[%c0_144, %c0_145, %c512_146], %153 {strides = array<i32>} : memref<1x64x1024xf32, #tpu.memory_space<vmem>>, vector<1x64x512xf32>,
    return
  }
  func.func @transform_0(%arg0: i32) -> (i32, i32, i32) {
    %c0_i32 = arith.constant 0 : i32
    %c0_i32_0 = arith.constant 0 : i32
    %c0_i32_1 = arith.constant 0 : i32
    return %arg0, %c0_i32, %c0_i32_0 : i32, i32, i32
  }
  func.func @transform_1(%arg0: i32) -> (i32, i32, i32) {
    %c0_i32 = arith.constant 0 : i32
    %c0_i32_0 = arith.constant 0 : i32
    %c0_i32_1 = arith.constant 0 : i32
    return %arg0, %c0_i32, %c0_i32_0 : i32, i32, i32
  }
}

</mosaic_0001>

<bundles_post_ra>
// kernel: mynet_forward.1
= control target key start
LH: loop header
LB: loop body
LE: loop exit
PB: predicated region body
PF: predicated region fallthrough
CT: control target
= control target key end

     0   :  { %s3520_s6 = smov 0   ;;  %s5170_s0 = inlined_call_operand.vmem [shape: f32[2,3,1024], index: 0, kind: input, shape index: {}]   ;;  %s5171_s1 = inlined_call_operand.vmem [shape: f32[2,64,1024], index: 1, kind: output, shape index: {}]  }
   0x1 LB: > { %s2910_s7 = sadd.s32 4294967295, %s3498_s6   ;;  %p2914_p0 = scmp.ge.s32.totalorder %s3498_s6, 1  ;;  %s3498_s6 = sphi %s3520_s6, %s11_s6  }
   0x2   : > { %p87_p1 = scmp.lt.s32.totalorder %s3498_s6, 3 }
   0x4   : > { %p88_p2 = pnand %p2914_p0, %p87_p1 }
   0x5   : > { %p107_p3 = scmp.lt.s32.totalorder (!%p88_p2), %s2910_s7, 1  ;;  %s3501_s12 = smov (!%p88_p2), 95  }
   0x6   : > { %91 = sbr.rel (%p88_p2) target bundleno = 1296 (0x510), region = 24  ;;  %s3502_s13 = smov (!%p88_p2), 97  }
   0x7   : > { %s3503_s14 = smov (!%p88_p2), 96   ;;  %s3504_s15 = smov (!%p88_p2), 127  }
   0x8   : > { %s3505_s16 = smov (!%p88_p2), 31   ;;  %s3506_s17 = smov (!%p88_p2), 1  }
   0x9   : > { %s3507_s18 = smov (!%p88_p2), 32   ;;  %s3508_s19 = smov (!%p88_p2), 33  }
   0xb   : > { %v3500_v0 = vmov 1.0   ;;  %s5490_s7 = smov (!%p107_p3, %s2910_s7), 1  ;;  %v127_v30 = vlaneseq  ;;  %v5207_v37 = vmov 0  ;;  %vm5178_vm1 = vcmask 777216  }
   0xc   : > { %122 = vst [vmem:[#allocation2 + $0x28] sm:$0xff] %v3500_v0  ;;  %s3001_s8 = sshll.u32 %s5490_s7, 5  ;;  %vm5174_vm2 = vcmask 793600   ;;  %vm5173_vm3 = vcmask 785408   ;;  %v5209_v51 = vmov 0  ;;  %v5211_v58 = vmov 0 }
   0xd   : > { %123 = vst [vmem:[#allocation2 + $0x8] sm:$0xff] %v3500_v0  ;;  %s3538_s11 = scalar_lea.vmem %s5170_s0, %s3001_s8  ;;  %v3632_v32 = vand.u32 127, %v127_v30  ;;  %vm5172_vm8 = vcmask 1039360   ;;  %vm5181_vm11 = vcmask 7168   ;;  %vm5175_vm13 = vcmask 252928   ;;  %s3002_s20 = sshll.u32 %s5490_s7, 9 }
   0xe   : > { %117 = vst [vmem:[#allocation2 + $0x30] sm:$0xff] %v3500_v0  ;;  %v162_v1 = vld [vmem:[%s3538_s11 + $0x10] sm:$0x77]  ;;  %v160_v2 = vld [vmem:[%s3538_s11] sm:$0x77]  ;;  %vm5179_vm14 = vcmask 269312   ;;  %s5091_s23 = scalar_lea.vmem %s5171_s1, %s3002_s20 }
   0xf   : > { %118 = vst [vmem:[#allocation2] sm:$0xff] %v3500_v0  ;;  %v161_v3 = vld [vmem:[%s3538_s11 + $0x8] sm:$0x77]  ;;  %v163_v15 = vld [vmem:[%s3538_s11 + $0x18] sm:$0x77]  ;;  %v136_v34 = vand.u32 31, %v3632_v32 }
  0x10   : > { %119 = vst [vmem:[#allocation2 + $0x18] sm:$0xff] %v3500_v0  ;;  %v130_v35 = vadd.s32 256, %v3632_v32  ;;  %v3643_v38 = vadd.s32 384, %v3632_v32  ;;  %v129_v43 = vadd.s32 128, %v3632_v32 }
  0x11   : > { %120 = vst [vmem:[#allocation2 + $0x10] sm:$0xff] %v3500_v0  ;;  %vm3638_vm0 = vcmp.le.s32.totalorder %v136_v34, 30  ;;  %vm3652_vm4 = vcmp.ge.s32.totalorder %v136_v34, 1 }
  0x12   : > { %172 = vst [vmem:[#allocation1 + $0x20] ss:$2 sm:$0xff] %v162_v1  ;;  %v5208_v37 = vsel %vm3638_vm0, 4294967295, %v5207_v37  ;;  %v138_v46 = vand.u32 31, %v130_v35  ;;  %v139_v50 = vand.u32 31, %v3643_v38  ;;  %v5210_v51 = vsel %vm3652_vm4, 4294967295, %v5209_v51 }
  0x13   : > { %121 = vst [vmem:[#allocation2 + $0x48] sm:$0xff] %v3500_v0  ;;  %v137_v54 = vand.u32 31, %v129_v43 }
  0x14   : > { %124 = vst [vmem:[#allocation2 + $0x20] sm:$0xff] %v3500_v0  ;;  %vm3665_vm6 = vcmp.le.s32.totalorder %v138_v46, 30  ;;  %vm3671_vm7 = vcmp.le.s32.totalorder %v139_v50, 30  ;;  %vm3681_vm9 = vcmp.ge.s32.totalorder %v138_v46, 1  ;;  %vm3739_vm12 = vcmp.ge.s32.totalorder %v139_v50, 1 }
  0x15   : > { %125 = vst [vmem:[#allocation2 + $0x40] sm:$0xff] %v3500_v0  ;;  %vm3661_vm5 = vcmp.le.s32.totalorder %v137_v54, 30  ;;  %vm3699_vm10 = vcmp.ge.s32.totalorder %v137_v54, 1 }
  0x16   : > { %168 = vst [vmem:[#allocation1] ss:$2 sm:$0xff] %v160_v2  ;;  %v5212_v58 = vsel %vm3661_vm5, 4294967295, %v5211_v58 }
  0x17   : > { %170 = vst [vmem:[#allocation1 + $0x10] ss:$2 sm:$0xff] %v161_v3 }
  0x18   : > { %174 = vst [vmem:[#allocation1 + $0x30] ss:$2 sm:$0xff] %v163_v15 }
  0x19   : > { %v179_v4 = vld.sshfl [vmem:[#allocation1 + $0x20] sm:$0xff pattern:$0x75316420]  ;;  %v180_v5 = vld.sshfl [vmem:[#allocation1 + $0x28] sm:$0xff pattern:$0x75316420] }
  0x1a   : > { %195 = vst [vmem:[#allocation2 + $0x28] sm:$0x7] %v179_v4 }
  0x1b   : > { %196 = vst [vmem:[#allocation2 + $0x8] sm:$0x7] %v180_v5 }
  0x1d   : > { %v175_v6 = vld.sshfl [vmem:[#allocation1] sm:$0xff pattern:$0x75316420]  ;;  %v176_v7 = vld.sshfl [vmem:[#allocation1 + $0x8] sm:$0xff pattern:$0x75316420] }
  0x1e   : > { %191 = vst [vmem:[#allocation2] sm:$0x7] %v175_v6  ;;  %v177_v8 = vld.sshfl [vmem:[#allocation1 + $0x10] sm:$0xff pattern:$0x75316420] }
  0x1f   : > { %192 = vst [vmem:[#allocation2 + $0x18] sm:$0x7] %v176_v7  ;;  %v178_v9 = vld.sshfl [vmem:[#allocation1 + $0x18] sm:$0xff pattern:$0x75316420] }
  0x20   : > { %193 = vst [vmem:[#allocation2 + $0x10] sm:$0x7] %v177_v8  ;;  %v181_v20 = vld.sshfl [vmem:[#allocation1 + $0x30] sm:$0xff pattern:$0x75316420] }
  0x21   : > { %v3548_v10 = vld [vmem:[#allocation2 + $0x28] sm:$0xff]  ;;  %194 = vst [vmem:[#allocation2 + $0x48] sm:$0x7] %v178_v9  ;;  %v182_v21 = vld.sshfl [vmem:[#allocation1 + $0x38] sm:$0xff pattern:$0x75316420] }
  0x22   : > { %v3550_v11 = vld [vmem:[#allocation2 + $0x8] sm:$0xff]  ;;  %197 = vst [vmem:[#allocation2 + $0x20] sm:$0x7] %v181_v20 }
  0x23   : > { %v3031_v12 = vpack.i.bf16 %v3550_v11, %v3548_v10  ;;  %198 = vst [vmem:[#allocation2 + $0x40] sm:$0x7] %v182_v21 }
  0x25   : > { %3032 = vrot.lane.b32.xlu1 %v3031_v12, %s3501_s12  ;;  %v3555_v13 = vld [vmem:[#allocation2] sm:$0xff] }
  0x26   : > { %v3557_v14 = vld [vmem:[#allocation2 + $0x18] sm:$0xff]  ;;  %v3081_v22 = vpack.i.bf16 %v3555_v13, %v3500_v0 }
  0x27   : > { %v3021_v16 = vpack.i.bf16 %v3557_v14, %v3555_v13  ;;  %v3564_v17 = vld [vmem:[#allocation2 + $0x10] sm:$0xff] }
  0x28   : > { %v3566_v18 = vld [vmem:[#allocation2 + $0x48] sm:$0xff]  ;;  %v3091_v23 = vpack.i.bf16 %v3564_v17, %v3557_v14 }
  0x29   : > { %3022 = vrot.lane.b32.xlu0 %v3021_v16, %s3501_s12  ;;  %3042 = vrot.lane.b32.xlu2 %v3021_v16, %s3502_s13  ;;  %v3026_v19 = vpack.i.bf16 %v3566_v18, %v3564_v17  ;;  %v3106_v24 = vpack.i.bf16 %v3548_v10, %v3566_v18  ;;  %v3591_v25 = vld [vmem:[#allocation2 + $0x20] sm:$0xff] }
  0x2a   : > { %v3593_v26 = vld [vmem:[#allocation2 + $0x40] sm:$0xff] }
  0x2b   : > { %v3598_v27 = vpack.i.bf16 %v3593_v26, %v3591_v25 }
  0x2d   : > { %3037 = vrot.lane.b32.xlu1 %v3021_v16, %s3503_s14 }
  0x31   : > { %3027 = vrot.lane.b32.xlu0 %v3026_v19, %s3501_s12  ;;  %3047 = vrot.lane.b32.xlu2 %v3026_v19, %s3503_s14 }
  0x35   : > { %3057 = vrot.lane.b32.xlu1 %v3021_v16, %s3504_s15 }
  0x39   : > { %3052 = vrot.lane.b32.xlu0 %v3031_v12, %s3503_s14  ;;  %3062 = vrot.lane.b32.xlu2 %v3026_v19, %s3502_s13 }
  0x3d   : > { %3072 = vrot.lane.b32.xlu1 %v3026_v19, %s3504_s15 }
  0x41   : > { %3067 = vrot.lane.b32.xlu0 %v3031_v12, %s3502_s13  ;;  %3077 = vrot.lane.b32.xlu2 %v3031_v12, %s3504_s15 }
  0x45   : > { %3087 = vrot.lane.b32.xlu1 %v3081_v22, %s3505_s16 }
  0x49   : > { %3092 = vrot.lane.b32.xlu2 %v3091_v23, %s3506_s17  ;;  %3082 = vrot.lane.b32.xlu0 %v3081_v22, %s3506_s17 }
  0x4d   : > { %3102 = vrot.lane.b32.xlu1 %v3091_v23, %s3505_s16 }
  0x51   : > { %3107 = vrot.lane.b32.xlu2 %v3106_v24, %s3505_s16  ;;  %3097 = vrot.lane.b32.xlu0 %v3106_v24, %s3506_s17 }
  0x55   : > { %3117 = vrot.lane.b32.xlu1 %v3081_v22, %s3507_s18 }
  0x59   : > { %3112 = vrot.lane.b32.xlu0 %v3598_v27, %s3501_s12  ;;  %3122 = vrot.lane.b32.xlu2 %v3081_v22, %s3508_s19  ;;  %v5219_v22 = vmov 0 }
  0x5a   : > { %v5220_v22 = vsel %vm3699_vm10, 4294967295, %v5219_v22 }
  0x5d   : > { %3132 = vrot.lane.b32.xlu1 %v3106_v24, %s3507_s18 }
  0x61   : > { %3127 = vrot.lane.b32.xlu0 %v3091_v23, %s3507_s18  ;;  %3137 = vrot.lane.b32.xlu2 %v3598_v27, %s3503_s14 }
  0x65   : > { %3147 = vrot.lane.b32.xlu1 %v3106_v24, %s3508_s19 }
  0x69   : > { %3142 = vrot.lane.b32.xlu0 %v3091_v23, %s3508_s19  ;;  %3152 = vrot.lane.b32.xlu2 %v3598_v27, %s3502_s13 }
  0x6d   : > { %428 = vrot.lane.b32.xlu1 %v3550_v11, %s3506_s17 }
  0x71   : > { %513 = vrot.lane.b32.xlu0 %v3591_v25, %s3504_s15  ;;  %359 = vrot.lane.b32.xlu2 %v3550_v11, %s3505_s16 }
  0x75   : > { %229 = vrot.lane.b32.xlu1 %v3550_v11, %s3508_s19 }
  0x79   : > { %298 = vrot.lane.b32.xlu0 %v3550_v11, %s3507_s18 }
  0x7d   : > { %586 = vrot.lane.b32.xlu1 %v3500_v0, %s3502_s13 }
  0x83   : > { %v3623_v28 = vpop.permute.xlu2 %3042 }
  0x84   : > { %v3045_v39 = vunpack.i.h.bf16 %v3623_v28  ;;  %v3044_v40 = vunpack.i.l.bf16 %v3623_v28 }
  0x85   : > { %3177 = vrot.lane.b32.xlu1 %v3598_v27, %s3505_s16 }
  0x86   : > { %v589_v52 = vsel %vm5174_vm2, %v3044_v40, %v3045_v39 }
  0x87   : > { %v605_v61 = vsel %vm3652_vm4, %v589_v52, 1.0 }
  0x8b   : > { %v3627_v29 = vpop.permute.xlu2 %3047 }
  0x8c   : > { %v3050_v3 = vunpack.i.h.bf16 %v3627_v29  ;;  %v3049_v4 = vunpack.i.l.bf16 %v3627_v29 }
  0x8e   : > { %v660_v28 = vsel %vm5173_vm3, %v3049_v4, %v3050_v3 }
  0x93   : > { %v3634_v33 = vpop.permute.xlu2 %3062 }
  0x94   : > { %v3065_v55 = vunpack.i.h.bf16 %v3634_v33  ;;  %v3064_v62 = vunpack.i.l.bf16 %v3634_v33 }
  0x96   : > { %v591_v12 = vsel %vm5174_vm2, %v3064_v62, %v3065_v55  ;;  %v590_v23 = vsel %vm5174_vm2, %v3045_v39, %v3064_v62 }
  0x97   : > { %v3629_v31 = vpop.permute.xlu1 %3032  ;;  %v607_v34 = vsel %vm3681_vm9, %v591_v12, 1.0 }
  0x98   : > { %v3034_v63 = vunpack.i.l.bf16 %v3629_v31 }
  0x9b   : > { %v3023_v36 = vpop.permute.xlu0 %3022  ;;  %v3659_v56 = vpop.permute.xlu2 %3077 }
  0x9c   : > { %v3025_v41 = vunpack.i.h.bf16 %v3023_v36  ;;  %v3024_v42 = vunpack.i.l.bf16 %v3023_v36  ;;  %v606_v36 = vsel %vm3699_vm10, %v590_v23, 1.0  ;;  %v3770_v23 = vshrl.u32 %v127_v30, 7 }
  0x9e   : > { %v719_v45 = vsel %vm5178_vm1, %v3024_v42, %v3025_v41  ;;  %vm5176_vm15 = vcmp.lt.s32.totalorder %v3770_v23, 4 }
  0x9f   : > { %v3038_v44 = vpop.permute.xlu1 %3037  ;;  %v735_v49 = vsel %vm3638_vm0, %v719_v45, 1.0 }
  0xa0   : > { %v3040_v47 = vunpack.i.h.bf16 %v3038_v44  ;;  %v3039_v48 = vunpack.i.l.bf16 %v3038_v44  ;;  %841 = vmatpush.msra.mxu0 %v735_v49 }
  0xa2   : > { %v658_v53 = vsel %vm5173_vm3, %v3039_v48, %v3040_v47  ;;  %v659_v24 = vsel %vm5173_vm3, %v3040_v47, %v3049_v4 }
  0xa3   : > { %842 = vmatpush.msra.mxu0 %v658_v53  ;;  %v3028_v57 = vpop.permute.xlu0 %3027  ;;  %v3715_v40 = vpop.permute.xlu2 %3092  ;;  %v3079_v53 = vunpack.i.l.bf16 %v3659_v56 }
  0xa4   : > { %v3030_v1 = vunpack.i.h.bf16 %v3028_v57  ;;  %v3029_v2 = vunpack.i.l.bf16 %v3028_v57  ;;  %v3095_v42 = vunpack.i.h.bf16 %v3715_v40  ;;  %v3094_v43 = vunpack.i.l.bf16 %v3715_v40 }
  0xa5   : > { %843 = vmatpush.msra.mxu0 %v605_v61 }
  0xa6   : > { %v720_v6 = vsel %vm5178_vm1, %v3025_v41, %v3029_v2  ;;  %v721_v7 = vsel %vm5178_vm1, %v3029_v2, %v3030_v1  ;;  %v722_v8 = vsel %vm5178_vm1, %v3030_v1, %v3034_v63  ;;  %v437_v52 = vsel %vm5181_vm11, %v3094_v43, %v3095_v42 }
  0xa7   : > { %v3058_v9 = vpop.permute.xlu1 %3057  ;;  %v736_v15 = vsel %vm3661_vm5, %v720_v6, 1.0  ;;  %v737_v16 = vsel %vm3665_vm6, %v721_v7, 1.0  ;;  %v738_v19 = vsel %vm3671_vm7, %v722_v8, 1.0  ;;  %v453_v1 = vsel %vm3681_vm9, %v437_v52, 1.0 }
  0xa8   : > { %v3060_v20 = vunpack.i.h.bf16 %v3058_v9  ;;  %861 = vmatpush.msra.mxu1 %v736_v15  ;;  %881 = vmatpush.msra.mxu2 %v737_v16  ;;  %v3059_v21 = vunpack.i.l.bf16 %v3058_v9 }
  0xa9   : > { %901 = vmatpush.msra.mxu3 %v738_v19 }
  0xaa   : > { %862 = vmatpush.msra.mxu1 %v659_v24  ;;  %882 = vmatpush.msra.mxu2 %v660_v28  ;;  %v520_v29 = vsel %vm5172_vm8, %v3059_v21, %v3060_v20  ;;  %v132_v24 = vadd.s32 512, %v3632_v32 }
  0xab   : > { %v3709_v35 = vpop.permute.xlu0 %3052  ;;  %v536_v39 = vsel %vm3638_vm0, %v520_v29, 1.0 }
  0xac   : > { %v3054_v41 = vunpack.i.l.bf16 %v3709_v35  ;;  %863 = vmatpush.msra.mxu1 %v606_v36  ;;  %844 = vmatpush.msra.mxu0 %v536_v39 }
  0xad   : > { %883 = vmatpush.msra.mxu2 %v607_v34 }
  0xae   : > { %v661_v44 = vsel %vm5173_vm3, %v3050_v3, %v3054_v41  ;;  %845 = vmatpush.msra.mxu0 %v3555_v13  ;;  %v3755_v3 = vpop.permute.xlu2 %3107  ;;  %vm5180_vm3 = vcmask 261120  }
  0xaf   : > { %v3073_v45 = vpop.permute.xlu1 %3072  ;;  %902 = vmatpush.msra.mxu3 %v661_v44  ;;  %v3109_v28 = vunpack.i.l.bf16 %v3755_v3 }
  0xb0   : > { %v3075_v46 = vunpack.i.h.bf16 %v3073_v45  ;;  %v3074_v47 = vunpack.i.l.bf16 %v3073_v45 }
  0xb2   : > { %v521_v48 = vsel %vm5172_vm8, %v3060_v20, %v3074_v47  ;;  %v522_v49 = vsel %vm5172_vm8, %v3074_v47, %v3075_v46  ;;  %v523_v38 = vsel %vm5172_vm8, %v3075_v46, %v3079_v53 }
  0xb3   : > { %v537_v54 = vsel %vm3661_vm5, %v521_v48, 1.0  ;;  %v538_v13 = vsel %vm3665_vm6, %v522_v49, 1.0  ;;  %v3734_v57 = vpop.permute.xlu0 %3067  ;;  %v3035_v48 = vunpack.i.h.bf16 %v3629_v31  ;;  %v140_v49 = vand.u32 31, %v132_v24 }
  0xb4   : > { %864 = vmatpush.msra.mxu1 %v537_v54  ;;  %884 = vmatpush.msra.mxu2 %v538_v13  ;;  %v3069_v61 = vunpack.i.l.bf16 %v3734_v57  ;;  %v5233_v31 = vmov 0 }
  0xb6   : > { %865 = vmatpush.msra.mxu1 %v3557_v14  ;;  %885 = vmatpush.msra.mxu2 %v3564_v17  ;;  %v592_v2 = vsel %vm5174_vm2, %v3065_v55, %v3069_v61  ;;  %v539_v14 = vsel %vm3671_vm7, %v523_v38, 1.0  ;;  %v3775_v29 = vpop.permute.xlu2 %3122 }
  0xb7   : > { %v3088_v50 = vpop.permute.xlu1 %3087  ;;  %v608_v4 = vsel %vm3739_vm12, %v592_v2, 1.0  ;;  %v3124_v30 = vunpack.i.l.bf16 %v3775_v29 }
  0xb8   : > { %886 = vmatpush.msra.mxu2 %v453_v1  ;;  %903 = vmatpush.msra.mxu3 %v608_v4  ;;  %v3090_v17 = vunpack.i.h.bf16 %v3088_v50  ;;  %v3089_v33 = vunpack.i.l.bf16 %v3088_v50 }
  0xba   : > { %904 = vmatpush.msra.mxu3 %v539_v14  ;;  %v366_v12 = vsel %vm5175_vm13, %v3089_v33, %v3090_v17  ;;  %v5223_v14 = vmov 0  ;;  %v3509_v33 = vmov 0.0  }
  0xbb   : > { %v3083_v6 = vpop.permute.xlu0 %3082  ;;  %v382_v34 = vsel %vm3638_vm0, %v366_v12, 1.0 }
  0xbc   : > { %v3085_v55 = vunpack.i.h.bf16 %v3083_v6  ;;  %v3084_v7 = vunpack.i.l.bf16 %v3083_v6  ;;  %905 = vmatpush.msra.mxu3 %v3566_v18  ;;  %v753_v18 = vand.u32 7, %v3632_v32 }
  0xbe   : > { %v435_v8 = vsel %vm5181_vm11, %v3084_v7, %v3085_v55  ;;  %v436_v9 = vsel %vm5181_vm11, %v3085_v55, %v3094_v43  ;;  %v3125_v43 = vunpack.i.h.bf16 %v3775_v29  ;;  %vm755_vm8 = vcmp.lt.s32.totalorder %v753_v18, 3 }
  0xbf   : > { %v3103_v15 = vpop.permute.xlu1 %3102  ;;  %v451_v16 = vsel %vm3652_vm4, %v435_v8, 1.0  ;;  %v452_v19 = vsel %vm3699_vm10, %v436_v9, 1.0  ;;  %vm756_vm2 = vmand %vm5176_vm15, %vm755_vm8  ;;  %vm5177_vm8 = vcmask 588800   ;;  %v723_v55 = vsel %vm5178_vm1, %v3034_v63, %v3035_v48 }
  0xc0   : > { %v3105_v20 = vunpack.i.h.bf16 %v3103_v15  ;;  %v3104_v21 = vunpack.i.l.bf16 %v3103_v15  ;;  %846 = vmatpush.msra.mxu0 %v451_v16  ;;  %866 = vmatpush.msra.mxu1 %v452_v19  ;;  %v236_v1 = vsel %vm5179_vm14, %v3124_v30, %v3125_v43  ;;  %v3818_v6 = vsel %vm756_vm2, 1.0, %v3509_v33 }
  0xc1   : > { %v252_v4 = vsel %vm3652_vm4, %v236_v1, 1.0  ;;  %v3055_v7 = vunpack.i.h.bf16 %v3709_v35  ;;  %v3080_v9 = vunpack.i.h.bf16 %v3659_v56  ;;  %vm3834_vm2 = vcmp.ge.s32.totalorder %v140_v49, 1 }
  0xc2   : > { %v367_v36 = vsel %vm5175_vm13, %v3090_v17, %v3104_v21  ;;  %v368_v39 = vsel %vm5175_vm13, %v3104_v21, %v3105_v20  ;;  %847 = vmatpush.msra.mxu0 %v382_v34  ;;  %v369_v54 = vsel %vm5175_vm13, %v3105_v20, %v3109_v28  ;;  %vm3812_vm13 = vcmp.le.s32.totalorder %v140_v49, 30  ;;  %v3850_v21 = vpop.permute.xlu2 %3137 }
  0xc3   : > { %v383_v44 = vsel %vm3661_vm5, %v367_v36, 1.0  ;;  %v384_v45 = vsel %vm3665_vm6, %v368_v39, 1.0  ;;  %v3787_v46 = vpop.permute.xlu0 %3097  ;;  %v385_v40 = vsel %vm3671_vm7, %v369_v54, 1.0  ;;  %v5224_v14 = vsel %vm3812_vm13, 4294967295, %v5223_v14 }
  0xc4   : > { %867 = vmatpush.msra.mxu1 %v383_v44  ;;  %887 = vmatpush.msra.mxu2 %v384_v45  ;;  %v3099_v47 = vunpack.i.l.bf16 %v3787_v46  ;;  %v3070_v17 = vunpack.i.h.bf16 %v3734_v57  ;;  %v739_v12 = vsel %vm3812_vm13, %v723_v55, 1.0  ;;  %v3100_v15 = vunpack.i.h.bf16 %v3787_v46 }
  0xc5   : > { %v5225_v16 = vmov 0  ;;  %vm5227_vm15 = vcmask 793600   ;;  %vm5229_vm1 = vcmask 1039360   ;;  %v3110_v34 = vunpack.i.h.bf16 %v3755_v3 }
  0xc6   : > { %v438_v52 = vsel %vm5181_vm11, %v3095_v42, %v3099_v47  ;;  %v5226_v16 = vsel %vm3834_vm2, 4294967295, %v5225_v16  ;;  %v593_v63 = vsel %vm5227_vm15, %v3069_v61, %v3070_v17  ;;  %v524_v24 = vsel %vm5229_vm1, %v3079_v53, %v3080_v9 }
  0xc7   : > { %v3118_v13 = vpop.permute.xlu1 %3117  ;;  %v454_v2 = vsel %vm3739_vm12, %v438_v52, 1.0  ;;  %v609_v61 = vsel %vm3834_vm2, %v593_v63, 1.0  ;;  %v540_v30 = vsel %vm3812_vm13, %v524_v24, 1.0  ;;  %vm5230_vm1 = vcmask 252928  }
  0xc8   : > { %v3120_v38 = vunpack.i.h.bf16 %v3118_v13  ;;  %v3119_v50 = vunpack.i.l.bf16 %v3118_v13  ;;  %906 = vmatpush.msra.mxu3 %v454_v2  ;;  %vm5231_vm15 = vcmask 777216  }
  0xca   : > { %v305_v42 = vsel %vm5180_vm3, %v3119_v50, %v3120_v38  ;;  %907 = vmatpush.msra.mxu3 %v385_v40 }
  0xcb   : > { %848 = vmatpush.msra.mxu0 %v305_v42  ;;  %v3826_v8 = vpop.permute.xlu0 %3112  ;;  %v3889_v42 = vpop.permute.xlu2 %3152 }
  0xcc   : > { %v3154_v24 = vunpack.i.l.bf16 %v3889_v42 }
  0xcd   : > { %849 = vmatpush.msra.mxu0 %v252_v4  ;;  %v3114_v4 = vunpack.i.l.bf16 %v3826_v8 }
  0xce   : > { %2919 = vmatmul.msk.f32.vlgmr.msra.gmra.mxu0 %vm5177_vm8, %v3818_v6  ;;  %vm5228_vm8 = vcmask 785408  }
  0xcf   : > { %921 = vmatpush.msrb.mxu0 %v739_v12  ;;  %v3843_v19 = vpop.permute.xlu1 %3132  ;;  %v662_v20 = vsel %vm5228_vm8, %v3054_v41, %v3055_v7  ;;  %v439_v41 = vsel %vm5181_vm11, %v3099_v47, %v3100_v15  ;;  %v370_v47 = vsel %vm5230_vm1, %v3109_v28, %v3110_v34  ;;  %vm5232_vm8 = vcmask 588800  }
  0xd0   : > { %v3134_v36 = vunpack.i.l.bf16 %v3843_v19  ;;  %v3135_v53 = vunpack.i.h.bf16 %v3843_v19  ;;  %v455_v49 = vsel %vm3834_vm2, %v439_v41, 1.0  ;;  %v724_v41 = vsel %vm5231_vm15, %v3035_v48, %v3114_v4  ;;  %vm5235_vm15 = vmmov %vm5232_vm8 }
  0xd1   : > { %922 = vmatpush.msrb.mxu0 %v662_v20  ;;  %vm5241_vm11 = vcmask 1039360   ;;  %v3161_v19 = vpack.i.bf16 1.0, %v3593_v26 }
  0xd2   : > { %v309_v28 = vsel %vm5180_vm3, %v3134_v36, %v3135_v53 }
  0xd3   : > { %923 = vmatpush.msrb.mxu0 %v609_v61  ;;  %v3128_v39 = vpop.permute.xlu0 %3127 }
  0xd4   : > { %v3130_v44 = vunpack.i.h.bf16 %v3128_v39  ;;  %v3129_v45 = vunpack.i.l.bf16 %v3128_v39 }
  0xd5   : > { %924 = vmatpush.msrb.mxu0 %v540_v30 }
  0xd6   : > { %v306_v52 = vsel %vm5180_vm3, %v3120_v38, %v3129_v45  ;;  %v307_v13 = vsel %vm5180_vm3, %v3129_v45, %v3130_v44  ;;  %v308_v1 = vsel %vm5180_vm3, %v3130_v44, %v3134_v36  ;;  %v133_v38 = vadd.s32 640, %v3632_v32 }
  0xd7   : > { %925 = vmatpush.msrb.mxu0 %v3548_v10  ;;  %v3876_v54 = vpop.permute.xlu1 %3147  ;;  %868 = vmatpush.msra.mxu1 %v306_v52  ;;  %v386_v10 = vsel %vm3812_vm13, %v370_v47, 1.0  ;;  %v3139_v44 = vunpack.i.l.bf16 %v3850_v21 }
  0xd8   : > { %v3150_v2 = vunpack.i.h.bf16 %v3876_v54  ;;  %v3149_v50 = vunpack.i.l.bf16 %v3876_v54  ;;  %888 = vmatpush.msra.mxu2 %v307_v13  ;;  %908 = vmatpush.msra.mxu3 %v308_v1  ;;  %v141_v61 = vand.u32 31, %v133_v38 }
  0xd9   : > { %926 = vmatpush.msrb.mxu0 %v455_v49  ;;  %v5237_v49 = vmov 0 }
  0xda   : > { %v240_v40 = vsel %vm5179_vm14, %v3149_v50, %v3150_v2  ;;  %vm3914_vm1 = vcmp.le.s32.totalorder %v141_v61, 30  ;;  %vm3924_vm3 = vcmp.ge.s32.totalorder %v141_v61, 1  ;;  %v134_v61 = vadd.s32 768, %v3632_v32 }
  0xdb   : > { %927 = vmatpush.msrb.mxu0 %v386_v10  ;;  %v3143_v55 = vpop.permute.xlu0 %3142  ;;  %v256_v12 = vsel %vm3834_vm2, %v240_v40, 1.0  ;;  %v5234_v31 = vsel %vm3914_vm1, 4294967295, %v5233_v31  ;;  %v740_v48 = vsel %vm3914_vm1, %v724_v41, 1.0  ;;  %v5238_v49 = vsel %vm3924_vm3, 4294967295, %v5237_v49 }
  0xdc   : > { %v3145_v63 = vunpack.i.h.bf16 %v3143_v55  ;;  %v3144_v20 = vunpack.i.l.bf16 %v3143_v55  ;;  %vm5261_vm2 = vcmask 1039360  }
  0xdd   : > { %928 = vmatpush.msrb.mxu0 %v309_v28 }
  0xde   : > { %v237_v36 = vsel %vm5179_vm14, %v3125_v43, %v3144_v20  ;;  %v238_v39 = vsel %vm5179_vm14, %v3144_v20, %v3145_v63  ;;  %v239_v30 = vsel %vm5179_vm14, %v3145_v63, %v3149_v50  ;;  %vm5236_vm14 = vmmov %vm5232_vm8 }
  0xdf   : > { %929 = vmatpush.msrb.mxu0 %v256_v12  ;;  %v253_v45 = vsel %vm3699_vm10, %v237_v36, 1.0  ;;  %v254_v29 = vsel %vm3681_vm9, %v238_v39, 1.0  ;;  %v255_v43 = vsel %vm3739_vm12, %v239_v30, 1.0  ;;  %v3940_v13 = vpop.permute.xlu1 %428  ;;  %v3115_v12 = vunpack.i.h.bf16 %v3826_v8 }
  0xe0   : > { %2923 = vmatmul.msk.f32.vlgmr.msrb.gmra.mxu0 %vm5232_vm8, %v3818_v6  ;;  %869 = vmatpush.msra.mxu1 %v253_v45  ;;  %vm5239_vm8 = vcmask 793600   ;;  %v142_v36 = vand.u32 31, %v134_v61  ;;  %v3140_v45 = vunpack.i.h.bf16 %v3850_v21  ;;  %v135_v21 = vadd.s32 896, %v3632_v32 }
  0xe1   : > { %889 = vmatpush.msra.mxu2 %v254_v29  ;;  %2920 = vmatmul.msk.f32.vlgmr.msra.gmra.mxu1 %vm5235_vm15, %v3818_v6  ;;  %v594_v52 = vsel %vm5239_vm8, %v3070_v17, %v3154_v24  ;;  %vm5240_vm15 = vcmask 785408   ;;  %vm5242_vm8 = vcmask 7168  }
  0xe2   : > { %2921 = vmatmul.msk.f32.vlgmr.msra.gmra.mxu2 %vm5236_vm14, %v3818_v6  ;;  %941 = vmatpush.msrb.mxu1 %v740_v48  ;;  %v663_v54 = vsel %vm5240_vm15, %v3055_v7, %v3139_v44  ;;  %v610_v17 = vsel %vm3924_vm3, %v594_v52, 1.0  ;;  %v440_v35 = vsel %vm5242_vm8, %v3100_v15, %v3940_v13  ;;  %v3956_v7 = vpop.permute.xlu2 %359  ;;  %vm5244_vm15 = vcmask 261120  }
  0xe3   : > { %909 = vmatpush.msra.mxu3 %v255_v43  ;;  %v3933_v47 = vpop.permute.xlu0 %513  ;;  %v456_v56 = vsel %vm3924_vm3, %v440_v35, 1.0  ;;  %vm5246_vm8 = vcmask 588800  }
  0xe4   : > { %2922 = vmatmul.msk.f32.vlgmr.msra.gmra.mxu3 %vm5236_vm14, %v3818_v6  ;;  %942 = vmatpush.msrb.mxu1 %v663_v54  ;;  %v525_v57 = vsel %vm5241_vm11, %v3080_v9, %v3933_v47  ;;  %vm5243_vm11 = vcmask 252928   ;;  %vm5245_vm14 = vcmask 269312  }
  0xe5   : > { %v541_v1 = vsel %vm3914_vm1, %v525_v57, 1.0  ;;  %v371_v9 = vsel %vm5243_vm11, %v3110_v34, %v3956_v7  ;;  %vm5247_vm11 = vcmask 777216  }
  0xe6   : > { %943 = vmatpush.msrb.mxu1 %v610_v17  ;;  %v387_v50 = vsel %vm3914_vm1, %v371_v9, 1.0  ;;  %v725_v41 = vsel %vm5247_vm11, %v3114_v4, %v3115_v12  ;;  %v3155_v4 = vunpack.i.h.bf16 %v3889_v42  ;;  %vm5253_vm11 = vcmask 793600  }
  0xe7   : > { %v3969_v15 = vpop.permute.xlu1 %229  ;;  %vm5262_vm1 = vcmask 785408  }
  0xe8   : > { %944 = vmatpush.msrb.mxu1 %v541_v1  ;;  %v595_v43 = vsel %vm5253_vm11, %v3154_v24, %v3155_v4  ;;  %vm5256_vm11 = vcmask 777216  }
  0xea   : > { %945 = vmatpush.msrb.mxu1 %v3550_v11  ;;  %v241_v11 = vsel %vm5245_vm14, %v3150_v2, %v3969_v15  ;;  %vm5250_vm14 = vcmask 785408  }
  0xeb   : > { %v3967_v46 = vpop.permute.xlu0 %298  ;;  %v257_v3 = vsel %vm3924_vm3, %v241_v11, 1.0  ;;  %v664_v8 = vsel %vm5250_vm14, %v3139_v44, %v3140_v45  ;;  %v143_v44 = vand.u32 31, %v135_v21  ;;  %vm5257_vm3 = vcmask 1039360  }
  0xec   : > { %946 = vmatpush.msrb.mxu1 %v456_v56  ;;  %v310_v10 = vsel %vm5244_vm15, %v3135_v53, %v3967_v46  ;;  %vm4041_vm15 = vcmp.le.s32.totalorder %v142_v36, 30 }
  0xed   : > { %v741_v30 = vsel %vm4041_vm15, %v725_v41, 1.0  ;;  %vm4078_vm14 = vcmp.le.s32.totalorder %v143_v44, 30 }
  0xee   : > { %947 = vmatpush.msrb.mxu1 %v387_v50  ;;  %961 = vmatpush.msrb.mxu2 %v741_v30 }
  0xef   : > { %v587_v50 = vpop.permute.xlu1 %586 }
  0xf0   : > { %948 = vmatpush.msrb.mxu1 %v310_v10  ;;  %962 = vmatpush.msrb.mxu2 %v664_v8 }
  0xf2   : > { %949 = vmatpush.msrb.mxu1 %v257_v3 }
  0xf3   : > { %2924 = vmatmul.msk.f32.vlgmr.msrb.gmra.mxu1 %vm5246_vm8, %v3818_v6  ;;  %vm4059_vm8 = vcmp.ge.s32.totalorder %v142_v36, 1 }
  0xf4   : > { %v611_v48 = vsel %vm4059_vm8, %v595_v43, 1.0 }
  0xf5   : > { %963 = vmatpush.msrb.mxu2 %v611_v48 }
 0x14b   : > { %v3981_v34 = vpop.f32.mrf.mxu0 }
 0x14c   : > { %v3985_v38 = vpack.i.bf16 %v3981_v34, %v3500_v0 }
 0x14e   : > { %3157 = vrot.lane.b32.xlu2 %v3985_v38, %s3501_s12  ;;  %3167 = vrot.lane.b32.xlu0 %v3985_v38, %s3503_s14 }
 0x156   : > { %3162 = vrot.lane.b32.xlu2 %v3161_v19, %s3504_s15  ;;  %3172 = vrot.lane.b32.xlu0 %v3598_v27, %s3506_s17 }
 0x15d   : > { %v4019_v40 = vpop.f32.mrf.mxu0 }
 0x15e   : > { %3182 = vrot.lane.b32.xlu2 %v3598_v27, %s3507_s18  ;;  %3187 = vrot.lane.b32.xlu0 %v3598_v27, %s3508_s19  ;;  %v3999_v53 = vpop.f32.mrf.mxu1 }
 0x15f   : > { %v3191_v2 = vpack.i.bf16 %v3999_v53, %v3981_v34 }
 0x161   : > { %3192 = vrot.lane.b32.xlu1 %v3191_v2, %s3502_s13 }
 0x165   : > { %v4007_v28 = vpop.f32.mrf.mxu2 }
 0x166   : > { %3197 = vrot.lane.b32.xlu0 %v3191_v2, %s3504_s15  ;;  %3207 = vrot.lane.b32.xlu2 %v3985_v38, %s3505_s16  ;;  %v4013_v27 = vpack.i.bf16 %v4007_v28, %v3999_v53 }
 0x167   : > { %v4023_v55 = vpop.f32.mrf.mxu3 }
 0x168   : > { %v4028_v63 = vpack.i.bf16 %v4019_v40, %v4023_v55  ;;  %v3226_v20 = vpack.i.bf16 %v4023_v55, %v4007_v28 }
 0x169   : > { %3212 = vrot.lane.b32.xlu1 %v3985_v38, %s3507_s18 }
 0x16e   : > { %3202 = vrot.lane.b32.xlu0 %v3985_v38, %s3506_s17  ;;  %3242 = vrot.lane.b32.xlu2 %v4013_v27, %s3505_s16 }
 0x170   : > { %v4085_v17 = vpop.f32.mrf.mxu1 }
 0x171   : > { %3217 = vrot.lane.b32.xlu1 %v4013_v27, %s3501_s12  ;;  %v3261_v1 = vpack.i.bf16 %v4085_v17, %v4019_v40 }
 0x176   : > { %3222 = vrot.lane.b32.xlu0 %v4013_v27, %s3503_s14  ;;  %3247 = vrot.lane.b32.xlu2 %v4028_v63, %s3501_s12 }
 0x179   : > { %3227 = vrot.lane.b32.xlu1 %v3226_v20, %s3502_s13 }
 0x17e   : > { %3232 = vrot.lane.b32.xlu0 %v3226_v20, %s3504_s15  ;;  %3252 = vrot.lane.b32.xlu2 %v4028_v63, %s3503_s14 }
 0x181   : > { %3262 = vrot.lane.b32.xlu1 %v3261_v1, %s3504_s15 }
 0x186   : > { %3237 = vrot.lane.b32.xlu0 %v4013_v27, %s3506_s17  ;;  %3257 = vrot.lane.b32.xlu2 %v3261_v1, %s3502_s13 }
 0x189   : > { %3267 = vrot.lane.b32.xlu1 %v4028_v63, %s3506_s17 }
 0x18e   : > { %3272 = vrot.lane.b32.xlu0 %v4028_v63, %s3505_s16 }
 0x196   : > { %3287 = vrot.lane.b32.xlu0 %v4013_v27, %s3507_s18 }
 0x19e   : > { %3307 = vrot.lane.b32.xlu0 %v4028_v63, %s3508_s19 }
 0x1a6   : > { %1316 = vrot.lane.b32.xlu0 %v3500_v0, %s3504_s15 }
 0x1a8   : > { %v4075_v52 = vpop.permute.xlu2 %3157 }
 0x1a9   : > { %v3159_v42 = vunpack.i.l.bf16 %v4075_v52 }
 0x1ab   : > { %v726_v54 = vsel %vm5256_vm11, %v3115_v12, %v3159_v42  ;;  %vm4101_vm11 = vcmp.ge.s32.totalorder %v143_v44, 1 }
 0x1ac   : > { %v742_v57 = vsel %vm4078_vm14, %v726_v54, 1.0 }
 0x1ad   : > { %981 = vmatpush.msrb.mxu3 %v742_v57 }
 0x1b0   : > { %v3163_v0 = vpop.permute.xlu2 %3162 }
 0x1b1   : > { %v3164_v35 = vunpack.i.l.bf16 %v3163_v0  ;;  %v3165_v10 = vunpack.i.h.bf16 %v3163_v0 }
 0x1b3   : > { %v526_v56 = vsel %vm5257_vm3, %v3933_v47, %v3164_v35  ;;  %vm5260_vm3 = vcmask 793600   ;;  %v527_v2 = vsel %vm5261_vm2, %v3164_v35, %v3165_v10  ;;  %vm5264_vm2 = vcmask 7168  }
 0x1b4   : > { %v542_v9 = vsel %vm4041_vm15, %v526_v56, 1.0  ;;  %v596_v47 = vsel %vm5260_vm3, %v3155_v4, %v587_v50  ;;  %v543_v36 = vsel %vm4078_vm14, %v527_v2, 1.0  ;;  %vm5263_vm3 = vcmask 252928  }
 0x1b5   : > { %964 = vmatpush.msrb.mxu2 %v542_v9  ;;  %v612_v61 = vsel %vm4101_vm11, %v596_v47, 1.0  ;;  %vm5266_vm13 = vmmov %vm5263_vm3 }
 0x1b7   : > { %965 = vmatpush.msrb.mxu2 %v3591_v25  ;;  %v3178_v25 = vpop.permute.xlu1 %3177 }
 0x1b8   : > { %v3180_v20 = vunpack.i.h.bf16 %v3178_v25  ;;  %v3179_v41 = vunpack.i.l.bf16 %v3178_v25  ;;  %v3183_v8 = vpop.permute.xlu2 %3182 }
 0x1b9   : > { %v3185_v21 = vunpack.i.h.bf16 %v3183_v8  ;;  %v3184_v54 = vunpack.i.l.bf16 %v3183_v8 }
 0x1ba   : > { %v373_v48 = vsel %vm5263_vm3, %v3179_v41, %v3180_v20  ;;  %v372_v42 = vsel %vm5266_vm13, %v3956_v7, %v3179_v41  ;;  %vm5267_vm3 = vcmask 261120  }
 0x1bb   : > { %v389_v0 = vsel %vm4078_vm14, %v373_v48, 1.0  ;;  %vm5268_vm13 = vmmov %vm5267_vm3 }
 0x1bc   : > { %v311_v35 = vsel %vm5268_vm13, %v3967_v46, %v3184_v54 }
 0x1c0   : > { %v4098_v11 = vpop.permute.xlu0 %3167 }
 0x1c1   : > { %v3169_v3 = vunpack.i.l.bf16 %v4098_v11 }
 0x1c3   : > { %v665_v12 = vsel %vm5262_vm1, %v3140_v45, %v3169_v3  ;;  %vm5265_vm1 = vmmov %vm5264_vm2 }
 0x1c4   : > { %982 = vmatpush.msrb.mxu3 %v665_v12 }
 0x1c6   : > { %983 = vmatpush.msrb.mxu3 %v612_v61 }
 0x1c8   : > { %v3173_v30 = vpop.permute.xlu0 %3172  ;;  %984 = vmatpush.msrb.mxu3 %v543_v36  ;;  %v3160_v36 = vunpack.i.h.bf16 %v4075_v52  ;;  %v3170_v52 = vunpack.i.h.bf16 %v4098_v11 }
 0x1c9   : > { %v3175_v43 = vunpack.i.h.bf16 %v3173_v30  ;;  %v3174_v4 = vunpack.i.l.bf16 %v3173_v30 }
 0x1ca   : > { %985 = vmatpush.msrb.mxu3 %v3593_v26  ;;  %v388_v26 = vsel %vm4041_vm15, %v372_v42, 1.0 }
 0x1cb   : > { %v441_v45 = vsel %vm5264_vm2, %v3940_v13, %v3174_v4  ;;  %v442_v44 = vsel %vm5265_vm1, %v3174_v4, %v3175_v43  ;;  %v312_v13 = vsel %vm5267_vm3, %v3184_v54, %v3185_v21  ;;  %vm5269_vm2 = vcmask 269312  }
 0x1cc   : > { %v457_v57 = vsel %vm4059_vm8, %v441_v45, 1.0  ;;  %v458_v1 = vsel %vm4101_vm11, %v442_v44, 1.0  ;;  %vm5270_vm1 = vmmov %vm5269_vm2  ;;  %vm5271_vm3 = vcmask 588800  }
 0x1cd   : > { %966 = vmatpush.msrb.mxu2 %v457_v57  ;;  %986 = vmatpush.msrb.mxu3 %v458_v1  ;;  %vm5272_vm13 = vmmov %vm5271_vm3 }
 0x1cf   : > { %967 = vmatpush.msrb.mxu2 %v388_v26  ;;  %987 = vmatpush.msrb.mxu3 %v389_v0 }
 0x1d0   : > { %v3188_v7 = vpop.permute.xlu0 %3187 }
 0x1d1   : > { %v3190_v56 = vunpack.i.h.bf16 %v3188_v7  ;;  %v3189_v9 = vunpack.i.l.bf16 %v3188_v7  ;;  %968 = vmatpush.msrb.mxu2 %v311_v35  ;;  %988 = vmatpush.msrb.mxu3 %v312_v13 }
 0x1d3   : > { %v242_v50 = vsel %vm5269_vm2, %v3969_v15, %v3189_v9  ;;  %v243_v10 = vsel %vm5270_vm1, %v3189_v9, %v3190_v56  ;;  %v3193_v3 = vpop.permute.xlu1 %3192  ;;  %v4143_v15 = vpop.permute.xlu2 %3207  ;;  %vm5273_vm2 = vcmask 777216  }
 0x1d4   : > { %v258_v47 = vsel %vm4059_vm8, %v242_v50, 1.0  ;;  %v259_v2 = vsel %vm4101_vm11, %v243_v10, 1.0  ;;  %v3195_v8 = vunpack.i.h.bf16 %v3193_v3  ;;  %v3194_v43 = vunpack.i.l.bf16 %v3193_v3  ;;  %vm5274_vm1 = vmmov %vm5273_vm2 }
 0x1d5   : > { %969 = vmatpush.msrb.mxu2 %v258_v47  ;;  %989 = vmatpush.msrb.mxu3 %v259_v2  ;;  %v3210_v47 = vunpack.i.h.bf16 %v4143_v15  ;;  %v3209_v2 = vunpack.i.l.bf16 %v4143_v15 }
 0x1d6   : > { %2925 = vmatmul.msk.f32.vlgmr.msrb.gmra.mxu2 %vm5271_vm3, %v3818_v6  ;;  %2926 = vmatmul.msk.f32.vlgmr.msrb.gmra.mxu3 %vm5272_vm13, %v3818_v6  ;;  %vm5275_vm3 = vcmask 793600   ;;  %vm5276_vm13 = vcmask 1039360  }
 0x1d7   : > { %v1386_v1 = vsel %vm5275_vm3, %v3194_v43, %v3195_v8 }
 0x1d8   : > { %v4141_v46 = vpop.permute.xlu0 %3197  ;;  %v1402_v50 = vsel %vm3652_vm4, %v1386_v1, 1.0 }
 0x1d9   : > { %v3200_v4 = vunpack.i.h.bf16 %v4141_v46  ;;  %v3199_v6 = vunpack.i.l.bf16 %v4141_v46 }
 0x1db   : > { %v4145_v12 = vpop.permute.xlu1 %3212  ;;  %v4149_v20 = vpop.permute.xlu2 %3242  ;;  %v1318_v0 = vsel %vm5276_vm13, %v3199_v6, %v3200_v4  ;;  %vm5279_vm13 = vcmask 7168  }
 0x1dc   : > { %v1334_v46 = vsel %vm3638_vm0, %v1318_v0, 1.0 }
 0x1e0   : > { %v4147_v25 = vpop.permute.xlu0 %3202 }
 0x1e1   : > { %v3205_v26 = vunpack.i.h.bf16 %v4147_v25  ;;  %v3204_v13 = vunpack.i.l.bf16 %v4147_v25 }
 0x1e3   : > { %v3218_v61 = vpop.permute.xlu1 %3217  ;;  %v4169_v11 = vpop.permute.xlu2 %3247 }
 0x1e4   : > { %v3220_v41 = vunpack.i.h.bf16 %v3218_v61  ;;  %v3219_v30 = vunpack.i.l.bf16 %v3218_v61  ;;  %v3250_v10 = vunpack.i.h.bf16 %v4169_v11  ;;  %v3249_v3 = vunpack.i.l.bf16 %v4169_v11 }
 0x1e5   : > { %v1234_v61 = vsel %vm5279_vm13, %v3204_v13, %v3205_v26  ;;  %vm5283_vm13 = vcmask 1039360  }
 0x1e6   : > { %v1514_v48 = vsel %vm5273_vm2, %v3160_v36, %v3219_v30  ;;  %v1515_v21 = vsel %vm5274_vm1, %v3219_v30, %v3220_v41  ;;  %vm5277_vm2 = vcmask 785408  }
 0x1e7   : > { %v1530_v45 = vsel %vm3638_vm0, %v1514_v48, 1.0  ;;  %v1531_v42 = vsel %vm3661_vm5, %v1515_v21, 1.0  ;;  %vm5278_vm1 = vmmov %vm5277_vm2 }
 0x1e8   : > { %v3223_v44 = vpop.permute.xlu0 %3222  ;;  %1631 = vmatpush.msra.mxu0 %v1530_v45  ;;  %1651 = vmatpush.msra.mxu1 %v1531_v42  ;;  %v3214_v42 = vunpack.i.l.bf16 %v4145_v12 }
 0x1e9   : > { %v3225_v54 = vunpack.i.h.bf16 %v3223_v44  ;;  %v3224_v57 = vunpack.i.l.bf16 %v3223_v44  ;;  %v3215_v44 = vunpack.i.h.bf16 %v4145_v12 }
 0x1eb   : > { %v1454_v7 = vsel %vm5277_vm2, %v3170_v52, %v3224_v57  ;;  %v1455_v35 = vsel %vm5278_vm1, %v3224_v57, %v3225_v54  ;;  %v4167_v56 = vpop.permute.xlu1 %3227  ;;  %vm5280_vm2 = vcmask 777216   ;;  %v1250_v52 = vsel %vm3652_vm4, %v1234_v61, 1.0  ;;  %v4202_v0 = vpop.permute.xlu2 %3252 }
 0x1ec   : > { %1632 = vmatpush.msra.mxu0 %v1454_v7  ;;  %1652 = vmatpush.msra.mxu1 %v1455_v35  ;;  %v3229_v9 = vunpack.i.l.bf16 %v4167_v56  ;;  %v1516_v36 = vsel %vm5280_vm2, %v3220_v41, %v3249_v3  ;;  %vm5281_vm1 = vmmov %vm5280_vm2  ;;  %v3230_v43 = vunpack.i.h.bf16 %v4167_v56  ;;  %vm5284_vm2 = vcmask 793600  }
 0x1ed   : > { %v1517_v30 = vsel %vm5281_vm1, %v3249_v3, %v3250_v10  ;;  %v1532_v48 = vsel %vm3665_vm6, %v1516_v36, 1.0  ;;  %v3254_v7 = vunpack.i.l.bf16 %v4202_v0  ;;  %vm5285_vm1 = vmmov %vm5283_vm13  ;;  %v3244_v35 = vunpack.i.l.bf16 %v4149_v20 }
 0x1ee   : > { %1633 = vmatpush.msra.mxu0 %v1402_v50  ;;  %v1387_v25 = vsel %vm5275_vm3, %v3195_v8, %v3229_v9  ;;  %v1533_v8 = vsel %vm3671_vm7, %v1517_v30, 1.0  ;;  %1671 = vmatpush.msra.mxu2 %v1532_v48  ;;  %vm5282_vm3 = vcmask 252928   ;;  %v3255_v61 = vunpack.i.h.bf16 %v4202_v0 }
 0x1ef   : > { %v1403_v6 = vsel %vm3699_vm10, %v1387_v25, 1.0  ;;  %v1166_v45 = vsel %vm5282_vm3, %v3209_v2, %v3210_v47  ;;  %1691 = vmatpush.msra.mxu3 %v1533_v8  ;;  %vm5286_vm3 = vcmask 261120  }
 0x1f0   : > { %v3233_v15 = vpop.permute.xlu0 %3232  ;;  %1634 = vmatpush.msra.mxu0 %v1334_v46  ;;  %1653 = vmatpush.msra.mxu1 %v1403_v6  ;;  %v1182_v13 = vsel %vm3638_vm0, %v1166_v45, 1.0  ;;  %vm5305_vm0 = vnez %v5224_v14 }
 0x1f1   : > { %v3234_v21 = vunpack.i.l.bf16 %v3233_v15  ;;  %v3235_v41 = vunpack.i.h.bf16 %v3233_v15 }
 0x1f2   : > { %1635 = vmatpush.msra.mxu0 %v3981_v34  ;;  %v1388_v34 = vsel %vm5284_vm2, %v3229_v9, %v3230_v43  ;;  %vm5288_vm2 = vcmask 7168  }
 0x1f3   : > { %v1319_v57 = vsel %vm5283_vm13, %v3200_v4, %v3234_v21  ;;  %v1320_v12 = vsel %vm5285_vm1, %v3234_v21, %v3235_v41  ;;  %v1106_v4 = vsel %vm5286_vm3, %v3214_v42, %v3215_v44  ;;  %vm5287_vm13 = vcmask 785408   ;;  %v4233_v6 = vpop.permute.xlu2 %3257  ;;  %v4242_v21 = vpop.permute.xlu1 %3262 }
 0x1f4   : > { %1636 = vmatpush.msra.mxu0 %v1250_v52  ;;  %v1335_v1 = vsel %vm3661_vm5, %v1319_v57, 1.0  ;;  %v1456_v56 = vsel %vm5287_vm13, %v3225_v54, %v3254_v7  ;;  %v1404_v9 = vsel %vm3681_vm9, %v1388_v34, 1.0  ;;  %v1336_v2 = vsel %vm3665_vm6, %v1320_v12, 1.0  ;;  %vm5290_vm3 = vmmov %vm5287_vm13 }
 0x1f5   : > { %1654 = vmatpush.msra.mxu1 %v1335_v1  ;;  %1672 = vmatpush.msra.mxu2 %v1456_v56  ;;  %vm5289_vm1 = vcmask 252928   ;;  %v3259_v15 = vunpack.i.l.bf16 %v4233_v6  ;;  %vm5291_vm13 = vcmask 261120   ;;  %v3264_v45 = vunpack.i.l.bf16 %v4242_v21 }
 0x1f6   : > { %1637 = vmatpush.msra.mxu0 %v1182_v13  ;;  %v1167_v25 = vsel %vm5289_vm1, %v3210_v47, %v3244_v35  ;;  %vm5293_vm1 = vcmask 1039360  }
 0x1f7   : > { %1655 = vmatpush.msra.mxu1 %v3999_v53  ;;  %1673 = vmatpush.msra.mxu2 %v1404_v9  ;;  %v1183_v54 = vsel %vm3661_vm5, %v1167_v25, 1.0  ;;  %v1321_v42 = vsel %vm5293_vm1, %v3235_v41, %v3264_v45  ;;  %v3245_v41 = vunpack.i.h.bf16 %v4149_v20  ;;  %vm5304_vm5 = vcmask 269312  }
 0x1f8   : > { %v3238_v50 = vpop.permute.xlu0 %3237  ;;  %1638 = vmatpush.msra.mxu0 %v1106_v4 }
 0x1f9   : > { %v3239_v3 = vunpack.i.l.bf16 %v3238_v50  ;;  %1674 = vmatpush.msra.mxu2 %v1336_v2  ;;  %v3240_v34 = vunpack.i.h.bf16 %v3238_v50  ;;  %v4288_v50 = vld [vmem:[#allocation2 + $0x30] sm:$0xff] }
 0x1fb   : > { %v1235_v46 = vsel %vm5288_vm2, %v3205_v26, %v3239_v3  ;;  %1675 = vmatpush.msra.mxu2 %v4007_v28  ;;  %v1457_v26 = vsel %vm5290_vm3, %v3254_v7, %v3255_v61  ;;  %vm5292_vm2 = vcmask 793600   ;;  %v4268_v13 = vpop.permute.xlu1 %3267  ;;  %vm5294_vm3 = vcmask 7168  }
 0x1fc   : > { %v1251_v53 = vsel %vm3699_vm10, %v1235_v46, 1.0  ;;  %1692 = vmatpush.msra.mxu3 %v1457_v26  ;;  %v1389_v28 = vsel %vm5292_vm2, %v3230_v43, %v3259_v15  ;;  %v1236_v7 = vsel %vm5294_vm3, %v3239_v3, %v3240_v34  ;;  %v3269_v20 = vunpack.i.l.bf16 %v4268_v13  ;;  %vm5297_vm1 = vmmov %vm5294_vm3 }
 0x1fd   : > { %1656 = vmatpush.msra.mxu1 %v1251_v53  ;;  %v1405_v8 = vsel %vm3739_vm12, %v1389_v28, 1.0  ;;  %v1252_v56 = vsel %vm3681_vm9, %v1236_v7, 1.0  ;;  %vm5298_vm3 = vcmask 261120   ;;  %v5300_v26 = vmov 0 }
 0x1fe   : > { %1693 = vmatpush.msra.mxu3 %v1405_v8  ;;  %1676 = vmatpush.msra.mxu2 %v1252_v56 }
 0x1ff   : > { %1657 = vmatpush.msra.mxu1 %v1183_v54 }
 0x200   : > { %v4225_v36 = vpop.permute.xlu0 %3272 }
 0x201   : > { %v3275_v46 = vunpack.i.h.bf16 %v4225_v36 }
 0x208   : > { %v4230_v47 = vpop.permute.xlu0 %3287 }
 0x209   : > { %v3289_v30 = vunpack.i.l.bf16 %v4230_v47  ;;  %v3290_v3 = vunpack.i.h.bf16 %v4230_v47 }
 0x20b   : > { %v1107_v48 = vsel %vm5291_vm13, %v3215_v44, %v3289_v30  ;;  %v1337_v44 = vsel %vm3671_vm7, %v1321_v42, 1.0  ;;  %vm5295_vm13 = vcmask 252928  }
 0x20c   : > { %1658 = vmatpush.msra.mxu1 %v1107_v48  ;;  %1694 = vmatpush.msra.mxu3 %v1337_v44  ;;  %v1168_v12 = vsel %vm5295_vm13, %v3244_v35, %v3245_v41  ;;  %vm5296_vm2 = vmmov %vm5295_vm13 }
 0x20d   : > { %vm5299_vm13 = vmmov %vm5296_vm2 }
 0x20e   : > { %1695 = vmatpush.msra.mxu3 %v4023_v55  ;;  %v3274_v55 = vunpack.i.l.bf16 %v4225_v36 }
 0x210   : > { %v1169_v4 = vsel %vm5296_vm2, %v3245_v41, %v3274_v55  ;;  %v4316_v25 = vsel %vm5299_vm13, %v3274_v55, %v3275_v46  ;;  %vm4323_vm2 = vcmp.lt.s32.totalorder %v753_v18, 4  ;;  %vm5303_vm13 = vcmask 777216  }
 0x211   : > { %v1185_v9 = vsel %vm3671_vm7, %v1169_v4, 1.0  ;;  %v5301_v26 = vsel %vm4323_vm2, 4294967295, %v5300_v26  ;;  %v1186_v47 = vsel %vm5305_vm0, %v4316_v25, 1.0 }
 0x259   : > { %v4251_v52 = vpop.f32.mrf.mxu2  ;;  %v4253_v43 = vpop.f32.mrf.mxu3 }
 0x25a   : > { %v3276_v57 = vpack.i.bf16 %v4251_v52, %v4085_v17  ;;  %v3321_v1 = vpack.i.bf16 %v4253_v43, %v4251_v52  ;;  %v3316_v2 = vpack.i.bf16 %v4288_v50, %v4253_v43 }
 0x25c   : > { %3277 = vrot.lane.b32.xlu2 %v3276_v57, %s3501_s12  ;;  %3292 = vrot.lane.b32.xlu1 %v3276_v57, %s3503_s14 }
 0x25d   : > { %3322 = vrot.lane.b32.xlu0 %v3321_v1, %s3502_s13 }
 0x264   : > { %3282 = vrot.lane.b32.xlu2 %v3985_v38, %s3508_s19  ;;  %3297 = vrot.lane.b32.xlu1 %v4028_v63, %s3507_s18  ;;  %v1184_v38 = vsel %vm3665_vm6, %v1168_v12, 1.0  ;;  %v1237_v63 = vsel %vm5297_vm1, %v3240_v34, %v3269_v20  ;;  %vm5302_vm1 = vcmp.lt.s32.totalorder %v3770_v23, 4 }
 0x265   : > { %3337 = vrot.lane.b32.xlu0 %v3276_v57, %s3505_s16  ;;  %v1253_v35 = vsel %vm3739_vm12, %v1237_v63, 1.0  ;;  %1677 = vmatpush.msra.mxu2 %v1184_v38  ;;  %v3260_v38 = vunpack.i.h.bf16 %v4233_v6  ;;  %v3265_v63 = vunpack.i.h.bf16 %v4242_v21 }
 0x266   : > { %1696 = vmatpush.msra.mxu3 %v1253_v35 }
 0x268   : > { %1697 = vmatpush.msra.mxu3 %v1185_v9 }
 0x26c   : > { %3302 = vrot.lane.b32.xlu2 %v4013_v27, %s3508_s19  ;;  %1384 = vrot.lane.b32.xlu1 %v4288_v50, %s3502_s13  ;;  %v1108_v27 = vsel %vm5298_vm3, %v3289_v30, %v3290_v3  ;;  %v4327_v30 = vpop.permute.xlu0 %3307  ;;  %vm1547_vm3 = vmand %vm5302_vm1, %vm4323_vm2  ;;  %vm5306_vm1 = vcmask 588800   ;;  %vm5319_vm2 = vnez %v5238_v49 }
 0x26d   : > { %1104 = vrot.lane.b32.xlu0 %v4253_v43, %s3507_s18  ;;  %1678 = vmatpush.msra.mxu2 %v1108_v27  ;;  %v4340_v44 = vsel %vm1547_vm3, 1.0, %v3509_v33  ;;  %vm5308_vm3 = vcmask 269312  }
 0x274   : > { %3317 = vrot.lane.b32.xlu2 %v3316_v2, %s3503_s14  ;;  %3312 = vrot.lane.b32.xlu1 %v3316_v2, %s3501_s12  ;;  %v4345_v23 = vpop.permute.xlu0 %1316 }
 0x27c   : > { %3327 = vrot.lane.b32.xlu2 %v3321_v1, %s3504_s15  ;;  %3332 = vrot.lane.b32.xlu1 %v3276_v57, %s3506_s17 }
 0x284   : > { %1232 = vrot.lane.b32.xlu2 %v4253_v43, %s3506_s17  ;;  %1164 = vrot.lane.b32.xlu1 %v4253_v43, %s3505_s16 }
 0x28c   : > { %3342 = vrot.lane.b32.xlu2 %v3276_v57, %s3507_s18  ;;  %3347 = vrot.lane.b32.xlu1 %v3276_v57, %s3508_s19 }
 0x294   : > { %1036 = vrot.lane.b32.xlu2 %v4253_v43, %s3508_s19 }
 0x2b6   : > { %v4318_v53 = vpop.permute.xlu2 %3277 }
 0x2b7   : > { %v3279_v54 = vunpack.i.l.bf16 %v4318_v53  ;;  %v3280_v1 = vunpack.i.h.bf16 %v4318_v53 }
 0x2b9   : > { %v1518_v42 = vsel %vm5303_vm13, %v3250_v10, %v3279_v54 }
 0x2ba   : > { %v1534_v57 = vsel %vm5305_vm0, %v1518_v42, 1.0 }
 0x2be   : > { %v3283_v48 = vpop.permute.xlu2 %3282 }
 0x2bf   : > { %v3285_v28 = vunpack.i.h.bf16 %v3283_v48  ;;  %v3284_v8 = vunpack.i.l.bf16 %v3283_v48 }
 0x2c1   : > { %v1038_v32 = vsel %vm5304_vm5, %v3284_v8, %v3285_v28  ;;  %vm5307_vm5 = vmmov %vm5303_vm13 }
 0x2c2   : > { %v1054_v18 = vsel %vm3652_vm4, %v1038_v32, 1.0  ;;  %v1519_v34 = vsel %vm5307_vm5, %v3279_v54, %v3280_v1  ;;  %vm5309_vm13 = vmmov %vm5308_vm3  ;;  %vm5311_vm5 = vcmask 588800   ;;  %v3270_v32 = vunpack.i.h.bf16 %v4268_v13 }
 0x2c3   : > { %1639 = vmatpush.msra.mxu0 %v1054_v18  ;;  %vm5317_vm4 = vcmask 1039360  }
 0x2c4   : > { %2927 = vmatmul.msk.f32.vlgmr.msra.gmra.mxu0 %vm5306_vm1, %v4340_v44  ;;  %vm5310_vm1 = vnez %v5234_v31  ;;  %v1322_v6 = vsel %vm5317_vm4, %v3264_v45, %v3265_v63  ;;  %vm5320_vm4 = vcmask 7168  }
 0x2c5   : > { %1711 = vmatpush.msrb.mxu0 %v1534_v57  ;;  %v1535_v56 = vsel %vm5310_vm1, %v1519_v34, 1.0  ;;  %v3309_v57 = vunpack.i.l.bf16 %v4327_v30  ;;  %v1238_v21 = vsel %vm5320_vm4, %v3269_v20, %v3270_v32 }
 0x2c6   : > { %v3303_v11 = vpop.permute.xlu2 %3302 }
 0x2c7   : > { %v3305_v10 = vunpack.i.h.bf16 %v3303_v11  ;;  %v3304_v41 = vunpack.i.l.bf16 %v3303_v11 }
 0x2c9   : > { %v1039_v55 = vsel %vm5308_vm3, %v3285_v28, %v3304_v41  ;;  %v1040_v7 = vsel %vm5309_vm13, %v3304_v41, %v3305_v10  ;;  %vm5312_vm3 = vmmov %vm5311_vm5  ;;  %vm5313_vm13 = vcmask 793600  }
 0x2ca   : > { %v1055_v12 = vsel %vm3699_vm10, %v1039_v55, 1.0  ;;  %v1056_v4 = vsel %vm3681_vm9, %v1040_v7, 1.0  ;;  %v1390_v28 = vsel %vm5313_vm13, %v3259_v15, %v3260_v38  ;;  %vm5316_vm10 = vmmov %vm5313_vm13  ;;  %vm5318_vm13 = vnez %v5226_v16 }
 0x2cb   : > { %1659 = vmatpush.msra.mxu1 %v1055_v12  ;;  %1679 = vmatpush.msra.mxu2 %v1056_v4  ;;  %v1406_v15 = vsel %vm5318_vm13, %v1390_v28, 1.0  ;;  %v3310_v55 = vunpack.i.h.bf16 %v4327_v30 }
 0x2cc   : > { %2929 = vmatmul.msk.f32.vlgmr.msra.gmra.mxu2 %vm5311_vm5, %v4340_v44  ;;  %2928 = vmatmul.msk.f32.vlgmr.msra.gmra.mxu1 %vm5312_vm3, %v4340_v44  ;;  %vm5314_vm5 = vcmask 785408  }
 0x2cd   : > { %1731 = vmatpush.msrb.mxu1 %v1535_v56  ;;  %vm5315_vm3 = vmmov %vm5314_vm5  ;;  %v1254_v56 = vsel %vm5318_vm13, %v1238_v21, 1.0 }
 0x2ce   : > { %v4366_v35 = vpop.permute.xlu2 %3317  ;;  %v4368_v9 = vpop.permute.xlu1 %3292 }
 0x2cf   : > { %v3295_v2 = vunpack.i.h.bf16 %v4368_v9  ;;  %v3294_v27 = vunpack.i.l.bf16 %v4368_v9  ;;  %v4372_v54 = vpop.permute.xlu0 %3322 }
 0x2d0   : > { %v3324_v48 = vunpack.i.l.bf16 %v4372_v54 }
 0x2d1   : > { %v1458_v8 = vsel %vm5314_vm5, %v3255_v61, %v3294_v27  ;;  %v1459_v42 = vsel %vm5315_vm3, %v3294_v27, %v3295_v2  ;;  %v1338_v61 = vsel %vm5305_vm0, %v1322_v6, 1.0  ;;  %vm5322_vm5 = vcmask 261120  }
 0x2d2   : > { %1712 = vmatpush.msrb.mxu0 %v1458_v8  ;;  %1732 = vmatpush.msrb.mxu1 %v1459_v42  ;;  %v1391_v18 = vsel %vm5316_vm10, %v3260_v38, %v3324_v48  ;;  %vm5321_vm10 = vcmask 269312   ;;  %vm5323_vm3 = vcmask 1039360   ;;  %v3319_v6 = vunpack.i.l.bf16 %v4366_v35 }
 0x2d3   : > { %v1407_v0 = vsel %vm5319_vm2, %v1391_v18, 1.0  ;;  %v1041_v7 = vsel %vm5321_vm10, %v3305_v10, %v3309_v57  ;;  %vm5324_vm4 = vmmov %vm5321_vm10  ;;  %v3320_v18 = vunpack.i.h.bf16 %v4366_v35 }
 0x2d4   : > { %1713 = vmatpush.msrb.mxu0 %v1406_v15  ;;  %1733 = vmatpush.msrb.mxu1 %v1407_v0  ;;  %vm5325_vm10 = vmmov %vm5322_vm5 }
 0x2d6   : > { %v3328_v11 = vpop.permute.xlu2 %3327  ;;  %1714 = vmatpush.msrb.mxu0 %v1338_v61  ;;  %v4396_v41 = vpop.permute.xlu1 %3297 }
 0x2d7   : > { %v3329_v45 = vunpack.i.l.bf16 %v3328_v11  ;;  %v3299_v34 = vunpack.i.l.bf16 %v4396_v41  ;;  %v3300_v12 = vunpack.i.h.bf16 %v4396_v41  ;;  %v3330_v15 = vunpack.i.h.bf16 %v3328_v11 }
 0x2d8   : > { %1715 = vmatpush.msrb.mxu0 %v4019_v40  ;;  %v1057_v40 = vsel %vm3739_vm12, %v1041_v7, 1.0 }
 0x2d9   : > { %v1109_v4 = vsel %vm5322_vm5, %v3290_v3, %v3299_v34  ;;  %v1323_v20 = vsel %vm5323_vm3, %v3265_v63, %v3329_v45  ;;  %v1042_v3 = vsel %vm5324_vm4, %v3309_v57, %v3310_v55  ;;  %v1110_v10 = vsel %vm5325_vm10, %v3299_v34, %v3300_v12  ;;  %v3338_v57 = vpop.permute.xlu0 %3337 }
 0x2da   : > { %1698 = vmatpush.msra.mxu3 %v1109_v4  ;;  %1716 = vmatpush.msrb.mxu0 %v1254_v56  ;;  %v1339_v38 = vsel %vm5310_vm1, %v1323_v20, 1.0  ;;  %vm5326_vm5 = vcmask 588800   ;;  %v1058_v25 = vsel %vm5318_vm13, %v1042_v3, 1.0  ;;  %vm5328_vm4 = vcmask 777216  }
 0x2db   : > { %1734 = vmatpush.msrb.mxu1 %v1339_v38  ;;  %vm5327_vm3 = vmmov %vm5326_vm5  ;;  %vm5332_vm13 = vcmask 785408   ;;  %v3339_v11 = vunpack.i.l.bf16 %v3338_v57  ;;  %v3340_v9 = vunpack.i.h.bf16 %v3338_v57 }
 0x2dc   : > { %1699 = vmatpush.msra.mxu3 %v1057_v40  ;;  %1717 = vmatpush.msrb.mxu0 %v1186_v47  ;;  %vm5329_vm10 = vmmov %vm5328_vm4  ;;  %v1460_v53 = vsel %vm5332_vm13, %v3295_v2, %v3319_v6 }
 0x2dd   : > { %1735 = vmatpush.msrb.mxu1 %v4085_v17  ;;  %2930 = vmatmul.msk.f32.vlgmr.msra.gmra.mxu3 %vm5326_vm5, %v4340_v44  ;;  %v3325_v17 = vunpack.i.h.bf16 %v4372_v54  ;;  %vm5330_vm5 = vcmask 793600  }
 0x2de   : > { %v1385_v63 = vpop.permute.xlu1 %1384  ;;  %1718 = vmatpush.msrb.mxu0 %v1110_v10  ;;  %v1233_v27 = vpop.permute.xlu2 %1232 }
 0x2df   : > { %v1393_v34 = vsel %vm5330_vm5, %v3325_v17, %v1385_v63 }
 0x2e0   : > { %1719 = vmatpush.msrb.mxu0 %v1058_v25 }
 0x2e1   : > { %2931 = vmatmul.msk.f32.vlgmr.msrb.gmra.mxu0 %vm5327_vm3, %v4340_v44  ;;  %vm5331_vm3 = vmmov %vm5330_vm5 }
 0x2e2   : > { %v1392_v35 = vsel %vm5331_vm3, %v3324_v48, %v3325_v17  ;;  %v1409_v48 = vsel %vm4101_vm11, %v1393_v34, 1.0 }
 0x2e3   : > { %v1408_v20 = vsel %vm4059_vm8, %v1392_v35, 1.0 }
 0x2e6   : > { %v3313_v28 = vpop.permute.xlu1 %3312  ;;  %v3343_v38 = vpop.permute.xlu2 %3342 }
 0x2e7   : > { %v3315_v8 = vunpack.i.h.bf16 %v3313_v28  ;;  %v3314_v42 = vunpack.i.l.bf16 %v3313_v28  ;;  %v3344_v63 = vunpack.i.l.bf16 %v3343_v38  ;;  %v3345_v13 = vunpack.i.h.bf16 %v3343_v38 }
 0x2e9   : > { %v1520_v0 = vsel %vm5328_vm4, %v3280_v1, %v3314_v42  ;;  %v1521_v61 = vsel %vm5329_vm10, %v3314_v42, %v3315_v8  ;;  %vm5333_vm4 = vmmov %vm5332_vm13  ;;  %vm5334_vm10 = vcmask 1039360   ;;  %vm5337_vm13 = vcmask 252928  }
 0x2ea   : > { %v1536_v21 = vsel %vm4041_vm15, %v1520_v0, 1.0  ;;  %v1537_v54 = vsel %vm4078_vm14, %v1521_v61, 1.0  ;;  %v1461_v1 = vsel %vm5333_vm4, %v3319_v6, %v3320_v18  ;;  %v1324_v7 = vsel %vm5334_vm10, %v3329_v45, %v3330_v15  ;;  %vm5335_vm0 = vmmov %vm5334_vm10  ;;  %v1105_v6 = vpop.permute.xlu0 %1104 }
 0x2eb   : > { %1751 = vmatpush.msrb.mxu2 %v1536_v21  ;;  %1771 = vmatpush.msrb.mxu3 %v1537_v54  ;;  %v1325_v4 = vsel %vm5335_vm0, %v3330_v15, %v4345_v23  ;;  %v1340_v47 = vsel %vm4041_vm15, %v1324_v7, 1.0  ;;  %vm5336_vm0 = vcmask 7168   ;;  %v1171_v3 = vsel %vm5337_vm13, %v3275_v46, %v3339_v11  ;;  %vm5340_vm4 = vmmov %vm5337_vm13 }
 0x2ec   : > { %v1341_v45 = vsel %vm4078_vm14, %v1325_v4, 1.0  ;;  %vm5338_vm5 = vmmov %vm5336_vm0  ;;  %v1172_v17 = vsel %vm5340_vm4, %v3339_v11, %v3340_v9  ;;  %v1187_v36 = vsel %vm5310_vm1, %v1171_v3, 1.0  ;;  %vm5341_vm10 = vcmask 261120  }
 0x2ed   : > { %1752 = vmatpush.msrb.mxu2 %v1460_v53  ;;  %1772 = vmatpush.msrb.mxu3 %v1461_v1  ;;  %vm5339_vm3 = vmmov %vm5336_vm0 }
 0x2ee   : > { %v3333_v56 = vpop.permute.xlu1 %3332  ;;  %vm5343_vm13 = vmmov %vm5341_vm10  ;;  %v1037_v61 = vpop.permute.xlu2 %1036 }
 0x2ef   : > { %v3335_v2 = vunpack.i.h.bf16 %v3333_v56  ;;  %v3334_v40 = vunpack.i.l.bf16 %v3333_v56  ;;  %1753 = vmatpush.msrb.mxu2 %v1408_v20  ;;  %1773 = vmatpush.msrb.mxu3 %v1409_v48  ;;  %v1112_v42 = vsel %vm5343_vm13, %v3344_v63, %v3345_v13 }
 0x2f1   : > { %1754 = vmatpush.msrb.mxu2 %v1340_v47  ;;  %1774 = vmatpush.msrb.mxu3 %v1341_v45  ;;  %v1239_v23 = vsel %vm5336_vm0, %v3270_v32, %v3334_v40  ;;  %v1240_v10 = vsel %vm5338_vm5, %v3334_v40, %v3335_v2  ;;  %v1241_v28 = vsel %vm5339_vm3, %v3335_v2, %v1233_v27  ;;  %vm5342_vm0 = vmmov %vm5340_vm4  ;;  %vm5345_vm3 = vcmask 269312  }
 0x2f2   : > { %v1255_v25 = vsel %vm5319_vm2, %v1239_v23, 1.0  ;;  %v1256_v46 = vsel %vm4059_vm8, %v1240_v10, 1.0  ;;  %v1257_v32 = vsel %vm4101_vm11, %v1241_v28, 1.0  ;;  %vm5344_vm5 = vmmov %vm5341_vm10 }
 0x2f3   : > { %1736 = vmatpush.msrb.mxu1 %v1255_v25  ;;  %1755 = vmatpush.msrb.mxu2 %v4251_v52  ;;  %v1111_v52 = vsel %vm5341_vm10, %v3300_v12, %v3344_v63  ;;  %v1113_v15 = vsel %vm5344_vm5, %v3345_v13, %v1105_v6  ;;  %vm5346_vm4 = vmmov %vm5345_vm3 }
 0x2f4   : > { %1775 = vmatpush.msrb.mxu3 %v4253_v43  ;;  %v1188_v43 = vsel %vm4041_vm15, %v1172_v17, 1.0  ;;  %vm5347_vm10 = vmmov %vm5345_vm3 }
 0x2f5   : > { %1737 = vmatpush.msrb.mxu1 %v1187_v36  ;;  %1756 = vmatpush.msrb.mxu2 %v1256_v46 }
 0x2f6   : > { %1776 = vmatpush.msrb.mxu3 %v1257_v32  ;;  %v1165_v27 = vpop.permute.xlu1 %1164 }
 0x2f7   : > { %v1173_v8 = vsel %vm5342_vm0, %v3340_v9, %v1165_v27  ;;  %1738 = vmatpush.msrb.mxu1 %v1111_v52  ;;  %1757 = vmatpush.msrb.mxu2 %v1188_v43  ;;  %vm5348_vm0 = vcmask 588800  }
 0x2f8   : > { %v1189_v18 = vsel %vm4078_vm14, %v1173_v8, 1.0  ;;  %vm5349_vm13 = vmmov %vm5348_vm0 }
 0x2f9   : > { %1758 = vmatpush.msrb.mxu2 %v1112_v42  ;;  %1777 = vmatpush.msrb.mxu3 %v1189_v18  ;;  %vm5350_vm5 = vmmov %vm5348_vm0 }
 0x2fb   : > { %1778 = vmatpush.msrb.mxu3 %v1113_v15 }
 0x2fe   : > { %v3348_v41 = vpop.permute.xlu1 %3347 }
 0x2ff   : > { %v3350_v12 = vunpack.i.h.bf16 %v3348_v41  ;;  %v3349_v0 = vunpack.i.l.bf16 %v3348_v41 }
 0x301   : > { %v1043_v57 = vsel %vm5345_vm3, %v3310_v55, %v3349_v0  ;;  %v1044_v21 = vsel %vm5346_vm4, %v3349_v0, %v3350_v12  ;;  %v1045_v54 = vsel %vm5347_vm10, %v3350_v12, %v1037_v61  ;;  %vm5351_vm3 = vcmask 777216  }
 0x302   : > { %v1059_v34 = vsel %vm5319_vm2, %v1043_v57, 1.0  ;;  %v1060_v35 = vsel %vm4059_vm8, %v1044_v21, 1.0  ;;  %v1061_v53 = vsel %vm4101_vm11, %v1045_v54, 1.0  ;;  %vm5352_vm4 = vmmov %vm5351_vm3  ;;  %vm5353_vm10 = vcmask 785408  }
 0x303   : > { %1739 = vmatpush.msrb.mxu1 %v1059_v34  ;;  %1759 = vmatpush.msrb.mxu2 %v1060_v35 }
 0x304   : > { %1779 = vmatpush.msrb.mxu3 %v1061_v53  ;;  %2933 = vmatmul.msk.f32.vlgmr.msrb.gmra.mxu2 %vm5348_vm0, %v4340_v44  ;;  %vm5354_vm0 = vmmov %vm5353_vm10 }
 0x305   : > { %2934 = vmatmul.msk.f32.vlgmr.msrb.gmra.mxu3 %vm5349_vm13, %v4340_v44  ;;  %2932 = vmatmul.msk.f32.vlgmr.msrb.gmra.mxu1 %vm5350_vm5, %v4340_v44  ;;  %vm5355_vm13 = vmmov %vm5351_vm3 }
 0x306   : > { %vm5356_vm5 = vmmov %vm5351_vm3 }
 0x341   : > { %v4508_v30 = vpop.f32.mrf.mxu0 }
 0x342   : > { %1784 = vst [vmem:[#allocation2] sm:$0xff] %v4508_v30 }
 0x349   : > { %v4511_v55 = vpop.f32.mrf.mxu1 }
 0x34a   : > { %1785 = vst [vmem:[#allocation2 + $0x18] sm:$0xff] %v4511_v55  ;;  %2092 = vrot.lane.b32.xlu0 %v4511_v55, %s3504_s15 }
 0x34f   : > { %v4516_v1 = vpop.f32.mrf.mxu2 }
 0x350   : > { %1786 = vst [vmem:[#allocation2 + $0x10] sm:$0xff] %v4516_v1  ;;  %v3371_v20 = vpack.i.bf16 %v4516_v1, %v4511_v55 }
 0x35e   : > { %v4519_v11 = vpop.f32.mrf.mxu0 }
 0x35f   : > { %1788 = vst [vmem:[#allocation2 + $0x28] sm:$0xff] %v4519_v11  ;;  %v3351_v44 = vpack.i.bf16 %v4508_v30, %v4519_v11 }
 0x360   : > { %v4524_v7 = vpop.f32.mrf.mxu3 }
 0x361   : > { %1787 = vst [vmem:[#allocation2 + $0x48] sm:$0xff] %v4524_v7  ;;  %3352 = vrot.lane.b32.xlu1 %v3351_v44, %s3501_s12  ;;  %3357 = vrot.lane.b32.xlu0 %v3351_v44, %s3503_s14  ;;  %v3381_v4 = vpack.i.bf16 %v4524_v7, %v4516_v1  ;;  %v3411_v56 = vpack.i.bf16 %v4288_v50, %v4524_v7 }
 0x362   : > { %3362 = vrot.lane.b32.xlu2 %v3351_v44, %s3502_s13 }
 0x369   : > { %3367 = vrot.lane.b32.xlu1 %v3351_v44, %s3504_s15  ;;  %3382 = vrot.lane.b32.xlu0 %v3381_v4, %s3501_s12 }
 0x36a   : > { %3387 = vrot.lane.b32.xlu2 %v3381_v4, %s3503_s14 }
 0x371   : > { %3372 = vrot.lane.b32.xlu1 %v3371_v20, %s3506_s17  ;;  %3402 = vrot.lane.b32.xlu0 %v3371_v20, %s3508_s19 }
 0x372   : > { %3412 = vrot.lane.b32.xlu2 %v3411_v56, %s3506_s17 }
 0x379   : > { %3377 = vrot.lane.b32.xlu1 %v3371_v20, %s3505_s16  ;;  %3407 = vrot.lane.b32.xlu0 %v3381_v4, %s3504_s15 }
 0x37a   : > { %3417 = vrot.lane.b32.xlu2 %v3411_v56, %s3505_s16 }
 0x381   : > { %3392 = vrot.lane.b32.xlu1 %v3381_v4, %s3502_s13 }
 0x382   : > { %v4546_v48 = vpop.f32.mrf.mxu1  ;;  %3422 = vrot.lane.b32.xlu2 %v3411_v56, %s3507_s18 }
 0x383   : > { %1789 = vst [vmem:[#allocation2 + $0x8] sm:$0xff] %v4546_v48  ;;  %v3446_v40 = vpack.i.bf16 %v4546_v48, %v4288_v50 }
 0x387   : > { %v4550_v9 = vpop.f32.mrf.mxu2 }
 0x388   : > { %1790 = vst [vmem:[#allocation2 + $0x20] sm:$0xff] %v4550_v9  ;;  %v4553_v38 = vpop.f32.mrf.mxu3  ;;  %v3436_v2 = vpack.i.bf16 %v4550_v9, %v4511_v55  ;;  %v3451_v47 = vpack.i.bf16 %v4550_v9, %v4546_v48 }
 0x389   : > { %1791 = vst [vmem:[#allocation2 + $0x40] sm:$0xff] %v4553_v38  ;;  %3397 = vrot.lane.b32.xlu1 %v3371_v20, %s3507_s18  ;;  %v3481_v45 = vpack.i.bf16 %v4288_v50, %v4553_v38  ;;  %v3486_v3 = vpack.i.bf16 %v4553_v38, %v4550_v9 }
 0x38a   : > { %3437 = vrot.lane.b32.xlu0 %v3436_v2, %s3503_s14  ;;  %3432 = vrot.lane.b32.xlu2 %v3436_v2, %s3501_s12 }
 0x391   : > { %3427 = vrot.lane.b32.xlu1 %v3411_v56, %s3508_s19 }
 0x392   : > { %3442 = vrot.lane.b32.xlu0 %v3436_v2, %s3502_s13  ;;  %2008 = vrot.lane.b32.xlu2 %v4508_v30, %s3506_s17 }
 0x399   : > { %1880 = vrot.lane.b32.xlu1 %v4508_v30, %s3507_s18 }
 0x39a   : > { %1940 = vrot.lane.b32.xlu0 %v4508_v30, %s3505_s16  ;;  %1812 = vrot.lane.b32.xlu2 %v4508_v30, %s3508_s19 }
 0x3a1   : > { %3447 = vrot.lane.b32.xlu1 %v3446_v40, %s3504_s15 }
 0x3a2   : > { %2236 = vrot.lane.b32.xlu0 %v4546_v48, %s3503_s14  ;;  %2296 = vrot.lane.b32.xlu2 %v4546_v48, %s3501_s12 }
 0x3a9   : > { %3452 = vrot.lane.b32.xlu1 %v3451_v47, %s3506_s17 }
 0x3aa   : > { %2168 = vrot.lane.b32.xlu0 %v4546_v48, %s3502_s13  ;;  %3467 = vrot.lane.b32.xlu2 %v3451_v47, %s3508_s19 }
 0x3b1   : > { %3457 = vrot.lane.b32.xlu1 %v3451_v47, %s3505_s16 }
 0x3b2   : > { %3462 = vrot.lane.b32.xlu0 %v3451_v47, %s3507_s18  ;;  %3482 = vrot.lane.b32.xlu2 %v3481_v45, %s3502_s13 }
 0x3b9   : > { %3477 = vrot.lane.b32.xlu1 %v3481_v45, %s3503_s14 }
 0x3ba   : > { %3472 = vrot.lane.b32.xlu0 %v3481_v45, %s3501_s12  ;;  %2022 = vrot.lane.b32.xlu2 %v4553_v38, %s3506_s17 }
 0x3bc   : > { %v4593_v23 = vpop.permute.xlu2 %3362  ;;  %v4606_v10 = vpop.permute.xlu0 %2092 }
 0x3bd   : > { %v5202_v45 = vunpack.i.l.bf16 %v4593_v23 }
 0x3c1   : > { %2016 = vrot.lane.b32.xlu1 %v4519_v11, %s3506_s17 }
 0x3c2   : > { %3487 = vrot.lane.b32.xlu0 %v3486_v3, %s3504_s15  ;;  %1954 = vrot.lane.b32.xlu2 %v4553_v38, %s3505_s16 }
 0x3c4   : > { %v4602_v50 = vpop.permute.xlu2 %3387 }
 0x3c5   : > { %v3390_v43 = vunpack.i.h.bf16 %v4602_v50  ;;  %v3389_v8 = vunpack.i.l.bf16 %v4602_v50 }
 0x3c7   : > { %v2246_v12 = vsel %vm5353_vm10, %v3389_v8, %v3390_v43  ;;  %vm5359_vm10 = vcmask 793600  }
 0x3c9   : > { %1894 = vrot.lane.b32.xlu1 %v4553_v38, %s3507_s18 }
 0x3ca   : > { %1948 = vrot.lane.b32.xlu2 %v4519_v11, %s3505_s16  ;;  %1826 = vrot.lane.b32.xlu0 %v4553_v38, %s3508_s19 }
 0x3cc   : > { %v4612_v63 = vpop.permute.xlu2 %3412 }
 0x3cd   : > { %v3415_v62 = vunpack.i.h.bf16 %v4612_v63 }
 0x3d1   : > { %1820 = vrot.lane.b32.xlu1 %v4519_v11, %s3508_s19 }
 0x3d2   : > { %1888 = vrot.lane.b32.xlu0 %v4519_v11, %s3507_s18 }
 0x3d3   : > { %v4618_v25 = vpop.permute.xlu1 %3352  ;;  %v4620_v28 = vpop.permute.xlu0 %3357 }
 0x3d4   : > { %v4622_v17 = vpop.permute.xlu2 %3417  ;;  %v5205_v46 = vunpack.i.l.bf16 %v4618_v25  ;;  %v5204_v42 = vunpack.i.l.bf16 %v4620_v28  ;;  %v3355_v21 = vunpack.i.h.bf16 %v4618_v25 }
 0x3d6   : > { %v2247_v0 = vsel %vm5354_vm0, %v3390_v43, %v5204_v42  ;;  %vm5360_vm0 = vmmov %vm5359_vm10 }
 0x3db   : > { %v4624_v13 = vpop.permute.xlu1 %3367  ;;  %v3383_v36 = vpop.permute.xlu0 %3382 }
 0x3dc   : > { %v3385_v32 = vunpack.i.h.bf16 %v3383_v36  ;;  %v3384_v27 = vunpack.i.l.bf16 %v3383_v36  ;;  %v4627_v52 = vpop.permute.xlu2 %3422  ;;  %v5201_v3 = vunpack.i.l.bf16 %v4624_v13  ;;  %v3370_v50 = vunpack.i.h.bf16 %v4624_v13 }
 0x3de   : > { %v2306_v18 = vsel %vm5351_vm3, %v3384_v27, %v3385_v32  ;;  %v2307_v6 = vsel %vm5352_vm4, %v3385_v32, %v5205_v46  ;;  %vm5357_vm3 = vnez %v5208_v37  ;;  %vm5358_vm4 = vnez %v5212_v58 }
 0x3df   : > { %v2322_v15 = vsel %vm3665_vm6, %v2306_v18, 1.0  ;;  %v2323_v41 = vsel %vm3671_vm7, %v2307_v6, 1.0  ;;  %v3424_v46 = vunpack.i.l.bf16 %v4627_v52 }
 0x3e0   : > { %2516 = vmatpush.msra.mxu2 %v2322_v15  ;;  %2557 = vmatpush.msra.mxu3 %v2323_v41 }
 0x3e2   : > { %2517 = vmatpush.msra.mxu2 %v2246_v12  ;;  %2558 = vmatpush.msra.mxu3 %v2247_v0 }
 0x3e3   : > { %v4646_v61 = vpop.permute.xlu1 %3372  ;;  %v4651_v54 = vpop.permute.xlu0 %3402 }
 0x3e4   : > { %v4648_v57 = vpop.permute.xlu2 %3432  ;;  %v3375_v32 = vunpack.i.h.bf16 %v4646_v61 }
 0x3e5   : > { %v3434_v34 = vunpack.i.l.bf16 %v4648_v57 }
 0x3e7   : > { %v2304_v35 = vsel %vm5355_vm13, %v3355_v21, %v3434_v34  ;;  %v2305_v53 = vsel %vm5356_vm5, %v3434_v34, %v3384_v27  ;;  %v3374_v27 = vunpack.i.l.bf16 %v4646_v61  ;;  %vm5361_vm13 = vcmask 1039360  }
 0x3e8   : > { %v2320_v44 = vsel %vm5357_vm3, %v2304_v35, 1.0  ;;  %v2321_v4 = vsel %vm5358_vm4, %v2305_v53, 1.0  ;;  %vm5362_vm5 = vmmov %vm5361_vm13  ;;  %v5203_v35 = vunpack.i.l.bf16 %v4612_v63 }
 0x3e9   : > { %2434 = vmatpush.msra.mxu0 %v2320_v44  ;;  %2475 = vmatpush.msra.mxu1 %v2321_v4 }
 0x3eb   : > { %v4660_v56 = vpop.permute.xlu1 %3377  ;;  %v4664_v2 = vpop.permute.xlu0 %3407 }
 0x3ec   : > { %v4662_v20 = vpop.permute.xlu2 %2008  ;;  %v3410_v40 = vunpack.i.h.bf16 %v4664_v2  ;;  %v3409_v47 = vunpack.i.l.bf16 %v4664_v2  ;;  %v3380_v44 = vunpack.i.h.bf16 %v4660_v56  ;;  %v3379_v4 = vunpack.i.l.bf16 %v4660_v56 }
 0x3ed   : > { %v3435_v56 = vunpack.i.h.bf16 %v4648_v57 }
 0x3ee   : > { %v2110_v12 = vsel %vm5361_vm13, %v3409_v47, %v3410_v40  ;;  %v2111_v0 = vsel %vm5362_vm5, %v3410_v40, %v5201_v3  ;;  %v3405_v3 = vunpack.i.h.bf16 %v4651_v54  ;;  %vm5365_vm13 = vcmask 252928  }
 0x3ef   : > { %v2126_v40 = vsel %vm3665_vm6, %v2110_v12, 1.0  ;;  %vm5366_vm5 = vmmov %vm5365_vm13 }
 0x3f3   : > { %v4670_v36 = vpop.permute.xlu1 %3392 }
 0x3f4   : > { %v3395_v43 = vunpack.i.h.bf16 %v4670_v36  ;;  %v3394_v18 = vunpack.i.l.bf16 %v4670_v36  ;;  %v4676_v6 = vpop.permute.xlu2 %1812 }
 0x3f6   : > { %v2178_v15 = vsel %vm5359_vm10, %v3394_v18, %v3395_v43  ;;  %v2179_v41 = vsel %vm5360_vm0, %v3395_v43, %v5202_v45  ;;  %vm5363_vm10 = vcmask 7168   ;;  %v2127_v43 = vsel %vm3671_vm7, %v2111_v0, 1.0 }
 0x3f7   : > { %v2194_v21 = vsel %vm3681_vm9, %v2178_v15, 1.0  ;;  %v2195_v34 = vsel %vm3739_vm12, %v2179_v41, 1.0  ;;  %v2026_v53 = vsel %vm5363_vm10, %v3374_v27, %v3375_v32  ;;  %vm5364_vm0 = vmmov %vm5363_vm10  ;;  %v5206_v41 = vunpack.i.l.bf16 %v4622_v17 }
 0x3f8   : > { %2518 = vmatpush.msra.mxu2 %v2194_v21  ;;  %2559 = vmatpush.msra.mxu3 %v2195_v34  ;;  %v2027_v15 = vsel %vm5364_vm0, %v3375_v32, %v5203_v35  ;;  %v3360_v34 = vunpack.i.h.bf16 %v4620_v28  ;;  %v3404_v45 = vunpack.i.l.bf16 %v4651_v54  ;;  %v2042_v0 = vsel %vm3681_vm9, %v2026_v53, 1.0 }
 0x3f9   : > { %v1959_v35 = vsel %vm5366_vm5, %v3380_v44, %v5206_v41  ;;  %vm5367_vm10 = vcmask 785408   ;;  %vm5370_vm5 = vcmask 261120  }
 0x3fa   : > { %2519 = vmatpush.msra.mxu2 %v2126_v40  ;;  %2560 = vmatpush.msra.mxu3 %v2127_v43  ;;  %v2043_v40 = vsel %vm3739_vm12, %v2027_v15, 1.0  ;;  %v1958_v43 = vsel %vm5365_vm13, %v3379_v4, %v3380_v44  ;;  %vm5368_vm0 = vmmov %vm5367_vm10  ;;  %v1975_v41 = vsel %vm3671_vm7, %v1959_v35, 1.0  ;;  %vm5369_vm13 = vcmask 269312  }
 0x3fb   : > { %v4708_v21 = vpop.permute.xlu1 %3397  ;;  %v1974_v44 = vsel %vm3665_vm6, %v1958_v43, 1.0  ;;  %vm5372_vm6 = vnez %v5301_v26  ;;  %vm5373_vm7 = vmmov %vm5369_vm13 }
 0x3fc   : > { %v4713_v12 = vpop.permute.xlu0 %3437  ;;  %2520 = vmatpush.msra.mxu2 %v4516_v1  ;;  %2561 = vmatpush.msra.mxu3 %v4524_v7  ;;  %v3400_v1 = vunpack.i.h.bf16 %v4708_v21  ;;  %v3399_v7 = vunpack.i.l.bf16 %v4708_v21  ;;  %v4730_v53 = vpop.permute.xlu2 %2296  ;;  %v4754_v60 = vsel %vm5372_vm6, 1.0, %v3509_v33  ;;  %vm5379_vm6 = vnez %v5210_v51 }
 0x3fd   : > { %v3439_v32 = vunpack.i.l.bf16 %v4713_v12  ;;  %v3440_v21 = vunpack.i.h.bf16 %v4713_v12 }
 0x3fe   : > { %2521 = vmatpush.msra.mxu2 %v2042_v0  ;;  %2562 = vmatpush.msra.mxu3 %v2043_v40 }
 0x3ff   : > { %v2244_v42 = vsel %vm5367_vm10, %v3360_v34, %v3439_v32  ;;  %v2245_v15 = vsel %vm5368_vm0, %v3439_v32, %v3389_v8  ;;  %v1830_v34 = vsel %vm5369_vm13, %v3404_v45, %v3405_v3  ;;  %v1898_v8 = vsel %vm5370_vm5, %v3399_v7, %v3400_v1  ;;  %vm5371_vm10 = vmmov %vm5370_vm5 }
 0x400   : > { %2435 = vmatpush.msra.mxu0 %v2244_v42  ;;  %2476 = vmatpush.msra.mxu1 %v2245_v15  ;;  %v1899_v59 = vsel %vm5371_vm10, %v3400_v1, %v3424_v46  ;;  %v1846_v0 = vsel %vm3681_vm9, %v1830_v34, 1.0  ;;  %v3365_v32 = vunpack.i.h.bf16 %v4593_v23  ;;  %vm5374_vm0 = vcmask 1039360  }
 0x401   : > { %2522 = vmatpush.msra.mxu2 %v1974_v44  ;;  %2563 = vmatpush.msra.mxu3 %v1975_v41  ;;  %v2108_v26 = vsel %vm5374_vm0, %v3370_v50, %v4606_v10  ;;  %vm5375_vm13 = vcmask 588800   ;;  %vm5376_vm5 = vcmask 793600   ;;  %vm5378_vm10 = vmmov %vm5374_vm0  ;;  %vm5382_vm0 = vcmask 7168  }
 0x402   : > { %vm5377_vm9 = vmmov %vm5376_vm5  ;;  %v2124_v36 = vsel %vm5357_vm3, %v2108_v26, 1.0 }
 0x403   : > { %2523 = vmatpush.msra.mxu2 %v1898_v8  ;;  %2564 = vmatpush.msra.mxu3 %v1899_v59  ;;  %v4756_v42 = vpop.permute.xlu1 %3427 }
 0x404   : > { %v3429_v35 = vunpack.i.l.bf16 %v4756_v42  ;;  %v4759_v41 = vpop.permute.xlu0 %3442  ;;  %v4787_v34 = vpop.permute.xlu2 %3467  ;;  %v3430_v59 = vunpack.i.h.bf16 %v4756_v42 }
 0x405   : > { %v3444_v40 = vunpack.i.l.bf16 %v4759_v41  ;;  %2524 = vmatpush.msra.mxu2 %v1846_v0 }
 0x406   : > { %v1831_v33 = vsel %vm5373_vm7, %v3405_v3, %v3429_v35  ;;  %2951 = vmatmul.msk.f32.vlgmr.msra.gmra.mxu2 %vm5375_vm13, %v4754_v60  ;;  %v2109_v3 = vsel %vm5378_vm10, %v4606_v10, %v3409_v47  ;;  %vm5380_vm7 = vnez %v5220_v22  ;;  %v3420_v10 = vunpack.i.h.bf16 %v4622_v17 }
 0x407   : > { %v1847_v43 = vsel %vm3739_vm12, %v1831_v33, 1.0  ;;  %v2176_v5 = vsel %vm5376_vm5, %v3365_v32, %v3444_v40  ;;  %v2177_v1 = vsel %vm5377_vm9, %v3444_v40, %v3394_v18  ;;  %v2125_v2 = vsel %vm5358_vm4, %v2109_v3, 1.0  ;;  %vm5381_vm12 = vmmov %vm5375_vm13 }
 0x408   : > { %2565 = vmatpush.msra.mxu3 %v1847_v43  ;;  %v2192_v15 = vsel %vm5379_vm6, %v2176_v5, 1.0  ;;  %v2193_v44 = vsel %vm5380_vm7, %v2177_v1, 1.0  ;;  %v2024_v47 = vsel %vm5382_vm0, %v3415_v62, %v4662_v20  ;;  %vm5383_vm13 = vmmov %vm5382_vm0  ;;  %vm5384_vm5 = vcmask 252928  }
 0x409   : > { %2436 = vmatpush.msra.mxu0 %v2192_v15  ;;  %2477 = vmatpush.msra.mxu1 %v2193_v44  ;;  %v2025_v18 = vsel %vm5383_vm13, %v4662_v20, %v3374_v27  ;;  %vm5385_vm9 = vmmov %vm5384_vm5  ;;  %v2040_v61 = vsel %vm5379_vm6, %v2024_v47, 1.0  ;;  %v3425_v27 = vunpack.i.h.bf16 %v4627_v52  ;;  %v5389_v33 = vunpack.i.l.bf16 %v4618_v25 }
 0x40a   : > { %2959 = vmatmul.msk.f32.vlgmr.msra.gmra.mxu3 %vm5381_vm12, %v4754_v60  ;;  %v2041_v20 = vsel %vm5380_vm7, %v2025_v18, 1.0  ;;  %vm5386_vm10 = vmmov %vm5381_vm12  ;;  %vm5387_vm12 = vcmask 269312   ;;  %vm5390_vm13 = vcmask 777216   ;;  %v5396_v1 = vunpack.i.l.bf16 %v4620_v28 }
 0x40b   : > { %2437 = vmatpush.msra.mxu0 %v2124_v36  ;;  %2478 = vmatpush.msra.mxu1 %v2125_v2  ;;  %v1881_v50 = vpop.permute.xlu1 %1880  ;;  %vm5388_vm0 = vmmov %vm5387_vm12  ;;  %v2308_v26 = vsel %vm5390_vm13, %v5389_v33, %v4730_v53  ;;  %v3445_v28 = vunpack.i.h.bf16 %v4759_v41  ;;  %v5403_v62 = vunpack.i.l.bf16 %v4593_v23 }
 0x40c   : > { %v1941_v8 = vpop.permute.xlu0 %1940  ;;  %v1828_v40 = vsel %vm5388_vm0, %v3430_v59, %v4676_v6 }
 0x40d   : > { %v1956_v0 = vsel %vm5384_vm5, %v3420_v10, %v1941_v8  ;;  %v1957_v32 = vsel %vm5385_vm9, %v1941_v8, %v3379_v4  ;;  %2438 = vmatpush.msra.mxu0 %v4508_v30  ;;  %2479 = vmatpush.msra.mxu1 %v4511_v55  ;;  %v1829_v4 = vsel %vm5387_vm12, %v4676_v6, %v3404_v45  ;;  %vm5394_vm9 = vmmov %vm5386_vm10  ;;  %v4841_v45 = vpop.permute.xlu2 %3482  ;;  %v1844_v43 = vsel %vm5379_vm6, %v1828_v40, 1.0 }
 0x40e   : > { %2952 = vmatmul.msk.f32.gmra.mxu2 %vm5386_vm10, %v4754_v60  ;;  %v1972_v30 = vsel %vm5357_vm3, %v1956_v0, 1.0  ;;  %v1973_v55 = vsel %vm5358_vm4, %v1957_v32, 1.0  ;;  %vm5391_vm3 = vmmov %vm5390_vm13  ;;  %vm5392_vm4 = vcmask 261120   ;;  %vm5395_vm10 = vnez %v5224_v14 }
 0x40f   : > { %2439 = vmatpush.msra.mxu0 %v2040_v61  ;;  %2480 = vmatpush.msra.mxu1 %v2041_v20  ;;  %v2309_v37 = vsel %vm5391_vm3, %v4730_v53, %v3435_v56  ;;  %v1896_v58 = vsel %vm5392_vm4, %v3425_v27, %v1881_v50  ;;  %vm5393_vm5 = vmmov %vm5392_vm4  ;;  %v1845_v53 = vsel %vm5380_vm7, %v1829_v4, 1.0  ;;  %vm5397_vm12 = vcmask 785408  }
 0x410   : > { %v1897_v54 = vsel %vm5393_vm5, %v1881_v50, %v3399_v7  ;;  %v2324_v7 = vsel %vm5395_vm10, %v2308_v26, 1.0  ;;  %v2325_v5 = vsel %vm5310_vm1, %v2309_v37, 1.0  ;;  %vm5398_vm6 = vmmov %vm5397_vm12  ;;  %vm5404_vm4 = vcmask 793600  }
 0x411   : > { %2440 = vmatpush.msra.mxu0 %v1972_v30  ;;  %2481 = vmatpush.msra.mxu1 %v1973_v55  ;;  %vm5399_vm7 = vmmov %vm5394_vm9  ;;  %v5406_v10 = vunpack.i.l.bf16 %v4624_v13  ;;  %v3484_v59 = vunpack.i.l.bf16 %v4841_v45 }
 0x412   : > { %2960 = vmatmul.msk.f32.gmra.mxu3 %vm5394_vm9, %v4754_v60  ;;  %vm5400_vm0 = vmmov %vm5399_vm7  ;;  %vm5407_vm9 = vcmask 1039360  }
 0x413   : > { %2441 = vmatpush.msra.mxu0 %v1896_v58  ;;  %2482 = vmatpush.msra.mxu1 %v1897_v54  ;;  %v4843_v25 = vpop.permute.xlu1 %3447  ;;  %vm5401_vm13 = vmmov %vm5400_vm0 }
 0x414   : > { %v2237_v6 = vpop.permute.xlu0 %2236  ;;  %v3450_v22 = vunpack.i.h.bf16 %v4843_v25  ;;  %vm5402_vm3 = vmmov %vm5400_vm0 }
 0x415   : > { %2442 = vmatpush.msra.mxu0 %v1844_v43  ;;  %2483 = vmatpush.msra.mxu1 %v1845_v53  ;;  %v2248_v51 = vsel %vm5397_vm12, %v5396_v1, %v2237_v6  ;;  %v2249_v3 = vsel %vm5398_vm6, %v2237_v6, %v3440_v21  ;;  %v4870_v44 = vpop.permute.xlu2 %2022  ;;  %vm5405_vm5 = vmmov %vm5404_vm4  ;;  %vm5408_vm12 = vnez %v5226_v16 }
 0x416   : > { %2935 = vmatmul.msk.f32.vlgmr.msra.gmra.mxu0 %vm5399_vm7, %v4754_v60  ;;  %2943 = vmatmul.msk.f32.vlgmr.msra.gmra.mxu1 %vm5400_vm0, %v4754_v60  ;;  %v2112_v47 = vsel %vm5407_vm9, %v5406_v10, %v3450_v22  ;;  %vm5409_vm6 = vmmov %vm5400_vm0 }
 0x417   : > { %2666 = vmatpush.msrb.mxu0 %v2324_v7  ;;  %2707 = vmatpush.msrb.mxu1 %v2325_v5  ;;  %v2128_v23 = vsel %vm5395_vm10, %v2112_v47, 1.0  ;;  %vm5410_vm7 = vmmov %vm5400_vm0  ;;  %v5427_v5 = vunpack.i.l.bf16 %v4612_v63 }
 0x418   : > { %2953 = vmatmul.msk.f32.gmra.mxu2 %vm5401_vm13, %v4754_v60  ;;  %vm5411_vm13 = vmmov %vm5400_vm0 }
 0x419   : > { %2667 = vmatpush.msrb.mxu0 %v2248_v51  ;;  %2708 = vmatpush.msrb.mxu1 %v2249_v3  ;;  %vm5415_vm9 = vmmov %vm5400_vm0  ;;  %v3449_v3 = vunpack.i.l.bf16 %v4843_v25 }
 0x41a   : > { %2961 = vmatmul.msk.f32.gmra.mxu3 %vm5402_vm3, %v4754_v60  ;;  %vm5412_vm3 = vmmov %vm5400_vm0 }
 0x41b   : > { %v4868_v12 = vpop.permute.xlu1 %3452 }
 0x41c   : > { %v2169_v15 = vpop.permute.xlu0 %2168  ;;  %v3455_v43 = vunpack.i.h.bf16 %v4868_v12  ;;  %v3454_v53 = vunpack.i.l.bf16 %v4868_v12 }
 0x41d   : > { %v2180_v36 = vsel %vm5404_vm4, %v5403_v62, %v2169_v15  ;;  %v2181_v2 = vsel %vm5405_vm5, %v2169_v15, %v3445_v28  ;;  %v4900_v8 = vpop.permute.xlu2 %1954  ;;  %vm5413_vm4 = vmmov %vm5400_vm0 }
 0x41e   : > { %v2196_v41 = vsel %vm5408_vm12, %v2180_v36, 1.0  ;;  %v2197_v18 = vsel %vm5319_vm2, %v2181_v2, 1.0  ;;  %2936 = vmatmul.msk.f32.gmra.mxu0 %vm5409_vm6, %v4754_v60  ;;  %2944 = vmatmul.msk.f32.gmra.mxu1 %vm5410_vm7, %v4754_v60  ;;  %vm5414_vm5 = vmmov %vm5400_vm0  ;;  %vm5416_vm6 = vcmask 777216  }
 0x41f   : > { %2668 = vmatpush.msrb.mxu0 %v2196_v41  ;;  %2709 = vmatpush.msrb.mxu1 %v2197_v18  ;;  %vm5417_vm7 = vmmov %vm5416_vm6 }
 0x420   : > { %2954 = vmatmul.msk.f32.gmra.mxu2 %vm5400_vm0, %v4754_v60  ;;  %vm5418_vm0 = vcmask 793600  }
 0x421   : > { %2669 = vmatpush.msrb.mxu0 %v2128_v23  ;;  %v2182_v40 = vsel %vm5418_vm0, %v3445_v28, %v3484_v59 }
 0x422   : > { %2962 = vmatmul.msk.f32.gmra.mxu3 %vm5411_vm13, %v4754_v60  ;;  %vm5419_vm13 = vcmask 785408  }
 0x423   : > { %v4895_v13 = vpop.permute.xlu1 %3457  ;;  %2670 = vmatpush.msrb.mxu0 %v4519_v11  ;;  %v3485_v11 = vunpack.i.h.bf16 %v4841_v45  ;;  %v2198_v45 = vsel %vm4059_vm8, %v2182_v40, 1.0 }
 0x424   : > { %v4898_v50 = vpop.permute.xlu0 %3462  ;;  %v3460_v12 = vunpack.i.h.bf16 %v4895_v13 }
 0x425   : > { %v1949_v57 = vpop.permute.xlu2 %1948 }
 0x426   : > { %2937 = vmatmul.msk.f32.gmra.mxu0 %vm5412_vm3, %v4754_v60  ;;  %2945 = vmatmul.msk.f32.gmra.mxu1 %vm5413_vm4, %v4754_v60  ;;  %vm5420_vm3 = vmmov %vm5418_vm0  ;;  %vm5426_vm0 = vcmask 252928  }
 0x427   : > { %v2183_v58 = vsel %vm5420_vm3, %v3484_v59, %v3485_v11  ;;  %vm5429_vm3 = vcmask 1039360  }
 0x428   : > { %2955 = vmatmul.msk.f32.gmra.mxu2 %vm5414_vm5, %v4754_v60  ;;  %vm5421_vm5 = vmmov %vm5413_vm4  ;;  %v2199_v6 = vsel %vm4101_vm11, %v2183_v58, 1.0 }
 0x42a   : > { %2963 = vmatmul.msk.f32.gmra.mxu3 %vm5415_vm9, %v4754_v60  ;;  %vm5422_vm9 = vmmov %vm5419_vm13 }
 0x42b   : > { %v3478_v0 = vpop.permute.xlu1 %3477 }
 0x42c   : > { %v3480_v32 = vunpack.i.h.bf16 %v3478_v0  ;;  %v3473_v61 = vpop.permute.xlu0 %3472  ;;  %v3479_v30 = vunpack.i.l.bf16 %v3478_v0 }
 0x42d   : > { %v3475_v20 = vunpack.i.h.bf16 %v3473_v61  ;;  %v3474_v27 = vunpack.i.l.bf16 %v3473_v61  ;;  %v3465_v61 = vunpack.i.h.bf16 %v4898_v50 }
 0x42e   : > { %v2251_v37 = vsel %vm5419_vm13, %v3479_v30, %v3480_v32  ;;  %2938 = vmatmul.msk.f32.gmra.mxu0 %vm5413_vm4, %v4754_v60  ;;  %2946 = vmatmul.msk.f32.gmra.mxu1 %vm5421_vm5, %v4754_v60  ;;  %vm5428_vm13 = vcmask 7168   ;;  %vm5431_vm5 = vmmov %vm5429_vm3 }
 0x42f   : > { %v2310_v55 = vsel %vm5416_vm6, %v3435_v56, %v3474_v27  ;;  %v2311_v4 = vsel %vm5417_vm7, %v3474_v27, %v3475_v20  ;;  %v2250_v56 = vsel %vm5422_vm9, %v3440_v21, %v3479_v30  ;;  %vm5423_vm6 = vmmov %vm5413_vm4  ;;  %v5425_v21 = vunpack.i.l.bf16 %v4622_v17 }
 0x430   : > { %v2326_v33 = vsel %vm4041_vm15, %v2310_v55, 1.0  ;;  %v2327_v26 = vsel %vm4078_vm14, %v2311_v4, 1.0  ;;  %2956 = vmatmul.msk.f32.gmra.mxu2 %vm5423_vm6, %v4754_v60  ;;  %vm5424_vm7 = vmmov %vm5413_vm4  ;;  %v3459_v17 = vunpack.i.l.bf16 %v4895_v13  ;;  %v3469_v13 = vunpack.i.l.bf16 %v4787_v34 }
 0x431   : > { %2748 = vmatpush.msrb.mxu2 %v2326_v33  ;;  %2789 = vmatpush.msrb.mxu3 %v2327_v26  ;;  %v1960_v7 = vsel %vm5426_vm0, %v5425_v21, %v1949_v57  ;;  %vm5430_vm4 = vmmov %vm5429_vm3 }
 0x432   : > { %2964 = vmatmul.msk.f32.gmra.mxu3 %vm5424_vm7, %v4754_v60  ;;  %v1976_v63 = vsel %vm5395_vm10, %v1960_v7, 1.0  ;;  %vm5432_vm9 = vmmov %vm5428_vm13 }
 0x433   : > { %v2017_v54 = vpop.permute.xlu1 %2016  ;;  %2749 = vmatpush.msrb.mxu2 %v2250_v56  ;;  %2790 = vmatpush.msrb.mxu3 %v2251_v37  ;;  %v2030_v14 = vsel %vm5432_vm9, %v3454_v53, %v3455_v43  ;;  %vm5433_vm10 = vmmov %vm5423_vm6 }
 0x434   : > { %v2028_v1 = vsel %vm5428_vm13, %v5427_v5, %v2017_v54  ;;  %v3488_v51 = vpop.permute.xlu0 %3487  ;;  %vm5434_vm6 = vmmov %vm5432_vm9  ;;  %vm5437_vm13 = vcmask 252928   ;;  %v2046_v11 = vsel %vm4059_vm8, %v2030_v14, 1.0  ;;  %vm5441_vm9 = vcmask 269312  }
 0x435   : > { %v3490_v28 = vunpack.i.h.bf16 %v3488_v51  ;;  %v3489_v15 = vunpack.i.l.bf16 %v3488_v51  ;;  %2750 = vmatpush.msrb.mxu2 %v2198_v45  ;;  %2791 = vmatpush.msrb.mxu3 %v2199_v6  ;;  %v2044_v62 = vsel %vm5408_vm12, %v2028_v1, 1.0  ;;  %v2029_v25 = vsel %vm5434_vm6, %v2017_v54, %v3454_v53  ;;  %vm5435_vm7 = vmmov %vm5434_vm6 }
 0x436   : > { %2671 = vmatpush.msrb.mxu0 %v2044_v62  ;;  %2947 = vmatmul.msk.f32.gmra.mxu1 %vm5433_vm10, %v4754_v60  ;;  %v2031_v23 = vsel %vm5435_vm7, %v3455_v43, %v4870_v44  ;;  %vm5436_vm0 = vmmov %vm5433_vm10  ;;  %v1961_v59 = vsel %vm5437_vm13, %v1949_v57, %v3459_v17  ;;  %v3464_v44 = vunpack.i.l.bf16 %v4898_v50  ;;  %vm5443_vm6 = vcmask 261120  }
 0x437   : > { %v2113_v36 = vsel %vm5429_vm3, %v3450_v22, %v3489_v15  ;;  %v2114_v2 = vsel %vm5430_vm4, %v3489_v15, %v3490_v28  ;;  %v2115_v10 = vsel %vm5431_vm5, %v3490_v28, %v3449_v3  ;;  %v3470_v22 = vunpack.i.h.bf16 %v4787_v34  ;;  %2939 = vmatmul.msk.f32.gmra.mxu0 %vm5436_vm0, %v4754_v60  ;;  %vm5438_vm3 = vmmov %vm5437_vm13 }
 0x438   : > { %2672 = vmatpush.msrb.mxu0 %v1976_v63  ;;  %v2129_v47 = vsel %vm5310_vm1, %v2113_v36, 1.0  ;;  %v2130_v41 = vsel %vm4041_vm15, %v2114_v2, 1.0  ;;  %v2131_v18 = vsel %vm4078_vm14, %v2115_v10, 1.0  ;;  %v1962_v32 = vsel %vm5438_vm3, %v3459_v17, %v3460_v12  ;;  %vm5439_vm4 = vmmov %vm5438_vm3 }
 0x439   : > { %2710 = vmatpush.msrb.mxu1 %v2129_v47  ;;  %2751 = vmatpush.msrb.mxu2 %v2130_v41  ;;  %v2045_v34 = vsel %vm5319_vm2, %v2029_v25, 1.0  ;;  %vm5440_vm5 = vmmov %vm5436_vm0  ;;  %v1977_v50 = vsel %vm5310_vm1, %v1961_v59, 1.0  ;;  %v1834_v27 = vsel %vm5441_vm9, %v3469_v13, %v3470_v22  ;;  %v1902_v55 = vsel %vm5443_vm6, %v3464_v44, %v3465_v61 }
 0x43a   : > { %2792 = vmatpush.msrb.mxu3 %v2131_v18  ;;  %2957 = vmatmul.msk.f32.gmra.mxu2 %vm5440_vm5, %v4754_v60  ;;  %vm5442_vm10 = vmmov %vm5441_vm9  ;;  %v1850_v39 = vsel %vm4059_vm8, %v1834_v27, 1.0 }
 0x43b   : > { %2711 = vmatpush.msrb.mxu1 %v4546_v48  ;;  %2752 = vmatpush.msrb.mxu2 %v4550_v9  ;;  %v1895_v0 = vpop.permute.xlu1 %1894  ;;  %v1963_v48 = vsel %vm5439_vm4, %v3460_v12, %v4900_v8  ;;  %v2047_v9 = vsel %vm4101_vm11, %v2031_v23, 1.0  ;;  %vm5444_vm7 = vmmov %vm5436_vm0 }
 0x43c   : > { %2793 = vmatpush.msrb.mxu3 %v4553_v38  ;;  %v1827_v20 = vpop.permute.xlu0 %1826  ;;  %v1978_v38 = vsel %vm4041_vm15, %v1962_v32, 1.0  ;;  %v1979_v8 = vsel %vm4078_vm14, %v1963_v48, 1.0  ;;  %vm5445_vm1 = vmmov %vm5443_vm6 }
 0x43d   : > { %2712 = vmatpush.msrb.mxu1 %v2045_v34  ;;  %2753 = vmatpush.msrb.mxu2 %v2046_v11  ;;  %v1835_v30 = vsel %vm5442_vm10, %v3470_v22, %v1827_v20  ;;  %v1903_v31 = vsel %vm5445_vm1, %v3465_v61, %v1895_v0  ;;  %vm5446_vm15 = vmmov %vm5436_vm0 }
 0x43e   : > { %2794 = vmatpush.msrb.mxu3 %v2047_v9  ;;  %2948 = vmatmul.msk.f32.gmra.mxu1 %vm5444_vm7, %v4754_v60  ;;  %vm5447_vm14 = vmmov %vm5436_vm0  ;;  %v1851_v4 = vsel %vm4101_vm11, %v1835_v30, 1.0 }
 0x43f   : > { %2713 = vmatpush.msrb.mxu1 %v1977_v50  ;;  %2754 = vmatpush.msrb.mxu2 %v1978_v38  ;;  %vm5448_vm0 = vmmov %vm5441_vm9 }
 0x440   : > { %2795 = vmatpush.msrb.mxu3 %v1979_v8  ;;  %2940 = vmatmul.msk.f32.gmra.mxu0 %vm5447_vm14, %v4754_v60  ;;  %vm5449_vm13 = vmmov %vm5448_vm0 }
 0x441   : > { %2755 = vmatpush.msrb.mxu2 %v1902_v55  ;;  %2965 = vmatmul.msk.f32.gmra.mxu3 %vm5446_vm15, %v4754_v60  ;;  %vm5450_vm3 = vmmov %vm5440_vm5 }
 0x442   : > { %2796 = vmatpush.msrb.mxu3 %v1903_v31  ;;  %2958 = vmatmul.msk.f32.gmra.mxu2 %vm5450_vm3, %v4754_v60  ;;  %vm5451_vm8 = vmmov %vm5445_vm1 }
 0x443   : > { %2756 = vmatpush.msrb.mxu2 %v1850_v39  ;;  %v1821_v24 = vpop.permute.xlu1 %1820  ;;  %vm5452_vm4 = vmmov %vm5445_vm1 }
 0x444   : > { %v1832_v40 = vsel %vm5448_vm0, %v3429_v35, %v1821_v24  ;;  %v1833_v33 = vsel %vm5449_vm13, %v1821_v24, %v3469_v13  ;;  %2797 = vmatpush.msrb.mxu3 %v1851_v4  ;;  %v1889_v26 = vpop.permute.xlu0 %1888  ;;  %vm5453_vm11 = vmmov %vm5450_vm3 }
 0x445   : > { %v1900_v29 = vsel %vm5451_vm8, %v3424_v46, %v1889_v26  ;;  %v1901_v37 = vsel %vm5452_vm4, %v1889_v26, %v3464_v44  ;;  %v1848_v19 = vsel %vm5408_vm12, %v1832_v40, 1.0  ;;  %v1849_v42 = vsel %vm5319_vm2, %v1833_v33, 1.0  ;;  %vm5454_vm5 = vmmov %vm5450_vm3 }
 0x446   : > { %2673 = vmatpush.msrb.mxu0 %v1900_v29  ;;  %2714 = vmatpush.msrb.mxu1 %v1901_v37  ;;  %vm5455_vm9 = vmmov %vm5450_vm3 }
 0x447   : > { %2949 = vmatmul.msk.f32.gmra.mxu1 %vm5453_vm11, %v4754_v60  ;;  %vm5456_vm10 = vmmov %vm5450_vm3 }
 0x448   : > { %2674 = vmatpush.msrb.mxu0 %v1848_v19  ;;  %2715 = vmatpush.msrb.mxu1 %v1849_v42  ;;  %vm5457_vm6 = vmmov %vm5450_vm3 }
 0x449   : > { %2966 = vmatmul.msk.f32.gmra.mxu3 %vm5454_vm5, %v4754_v60  ;;  %2941 = vmatmul.msk.f32.gmra.mxu0 %vm5455_vm9, %v4754_v60  ;;  %vm5458_vm12 = vmmov %vm5450_vm3 }
 0x44a   : > { %2983 = vmatmul.msk.f32.vlgmr.msrb.gmra.mxu2 %vm5456_vm10, %v4754_v60  ;;  %vm5459_vm2 = vmmov %vm5450_vm3 }
 0x44b   : > { %vm5460_vm7 = vmmov %vm5459_vm2 }
 0x44c   : > { %vm5461_vm1 = vmmov %vm5459_vm2 }
 0x44d   : > { %vm5462_vm15 = vmmov %vm5461_vm1 }
 0x44e   : > { %vm5463_vm14 = vmmov %vm5461_vm1 }
 0x44f   : > { %2950 = vmatmul.msk.f32.gmra.mxu1 %vm5457_vm6, %v4754_v60  ;;  %vm5464_vm0 = vmmov %vm5461_vm1 }
 0x450   : > { %vm5465_vm13 = vmmov %vm5464_vm0 }
 0x451   : > { %2991 = vmatmul.msk.f32.vlgmr.msrb.gmra.mxu3 %vm5458_vm12, %v4754_v60  ;;  %2942 = vmatmul.msk.f32.gmra.mxu0 %vm5459_vm2, %v4754_v60  ;;  %vm5466_vm3 = vmmov %vm5464_vm0 }
 0x452   : > { %2984 = vmatmul.msk.f32.gmra.mxu2 %vm5460_vm7, %v4754_v60  ;;  %vm5467_vm8 = vmmov %vm5464_vm0 }
 0x453   : > { %vm5468_vm4 = vmmov %vm5464_vm0 }
 0x454   : > { %vm5469_vm11 = vmmov %vm5464_vm0 }
 0x455   : > { %vm5470_vm5 = vmmov %vm5464_vm0 }
 0x456   : > { %vm5471_vm9 = vmmov %vm5464_vm0 }
 0x457   : > { %2975 = vmatmul.msk.f32.vlgmr.msrb.gmra.mxu1 %vm5461_vm1, %v4754_v60  ;;  %vm5472_vm10 = vmmov %vm5464_vm0 }
 0x458   : > { %vm5473_vm6 = vmmov %vm5464_vm0 }
 0x459   : > { %2992 = vmatmul.msk.f32.gmra.mxu3 %vm5462_vm15, %v4754_v60  ;;  %2967 = vmatmul.msk.f32.vlgmr.msrb.gmra.mxu0 %vm5463_vm14, %v4754_v60  ;;  %vm5474_vm12 = vmmov %vm5464_vm0 }
 0x45a   : > { %2985 = vmatmul.msk.f32.gmra.mxu2 %vm5464_vm0, %v4754_v60  ;;  %vm5475_vm2 = vmmov %vm5464_vm0 }
 0x45b   : > { %vm5476_vm7 = vmmov %vm5464_vm0 }
 0x45c   : > { %vm5477_vm1 = vmmov %vm5464_vm0 }
 0x45d   : > { %vm5478_vm15 = vmmov %vm5464_vm0 }
 0x45e   : > { %vm5479_vm14 = vmmov %vm5464_vm0 }
 0x45f   : > { %2976 = vmatmul.msk.f32.gmra.mxu1 %vm5465_vm13, %v4754_v60  ;;  %vm5480_vm13 = vmmov %vm5464_vm0 }
 0x461   : > { %2993 = vmatmul.msk.f32.gmra.mxu3 %vm5466_vm3, %v4754_v60  ;;  %2968 = vmatmul.msk.f32.gmra.mxu0 %vm5467_vm8, %v4754_v60  ;;  %vm5481_vm3 = vmmov %vm5464_vm0 }
 0x462   : > { %2986 = vmatmul.msk.f32.gmra.mxu2 %vm5468_vm4, %v4754_v60  ;;  %vm5482_vm8 = vmmov %vm5464_vm0 }
 0x463   : > { %vm5483_vm4 = vmmov %vm5464_vm0 }
 0x467   : > { %2977 = vmatmul.msk.f32.gmra.mxu1 %vm5469_vm11, %v4754_v60  ;;  %vm5484_vm11 = vmmov %vm5464_vm0 }
 0x469   : > { %2994 = vmatmul.msk.f32.gmra.mxu3 %vm5470_vm5, %v4754_v60  ;;  %2969 = vmatmul.msk.f32.gmra.mxu0 %vm5471_vm9, %v4754_v60  ;;  %vm5485_vm5 = vmmov %vm5464_vm0 }
 0x46a   : > { %2987 = vmatmul.msk.f32.gmra.mxu2 %vm5472_vm10, %v4754_v60  ;;  %vm5486_vm9 = vmmov %vm5464_vm0 }
 0x46b   : > { %vm5487_vm10 = vmmov %vm5464_vm0 }
 0x46f   : > { %2978 = vmatmul.msk.f32.gmra.mxu1 %vm5473_vm6, %v4754_v60  ;;  %vm5488_vm6 = vmmov %vm5464_vm0 }
 0x471   : > { %2995 = vmatmul.msk.f32.gmra.mxu3 %vm5474_vm12, %v4754_v60  ;;  %2970 = vmatmul.msk.f32.gmra.mxu0 %vm5475_vm2, %v4754_v60 }
 0x472   : > { %2988 = vmatmul.msk.f32.gmra.mxu2 %vm5476_vm7, %v4754_v60 }
 0x477   : > { %2979 = vmatmul.msk.f32.gmra.mxu1 %vm5477_vm1, %v4754_v60 }
 0x479   : > { %2996 = vmatmul.msk.f32.gmra.mxu3 %vm5478_vm15, %v4754_v60  ;;  %2971 = vmatmul.msk.f32.gmra.mxu0 %vm5479_vm14, %v4754_v60 }
 0x47a   : > { %2989 = vmatmul.msk.f32.gmra.mxu2 %vm5464_vm0, %v4754_v60 }
 0x47f   : > { %2980 = vmatmul.msk.f32.gmra.mxu1 %vm5480_vm13, %v4754_v60 }
 0x481   : > { %2997 = vmatmul.msk.f32.gmra.mxu3 %vm5481_vm3, %v4754_v60  ;;  %2972 = vmatmul.msk.f32.gmra.mxu0 %vm5482_vm8, %v4754_v60 }
 0x482   : > { %2990 = vmatmul.msk.f32.gmra.mxu2 %vm5483_vm4, %v4754_v60 }
 0x487   : > { %2981 = vmatmul.msk.f32.gmra.mxu1 %vm5484_vm11, %v4754_v60 }
 0x489   : > { %2998 = vmatmul.msk.f32.gmra.mxu3 %vm5485_vm5, %v4754_v60  ;;  %v2526_v16 = vpop.f32.mrf.mxu2  ;;  %2973 = vmatmul.msk.f32.gmra.mxu0 %vm5486_vm9, %v4754_v60 }
 0x48a   : > { %2593 = vst [vmem:[%s5091_s23 + $0x10] sm:$0xff] %v2526_v16 }
 0x48d   : > { %v2567_v49 = vpop.f32.mrf.mxu3 }
 0x48e   : > { %2594 = vst [vmem:[%s5091_s23 + $0x18] sm:$0xff] %v2567_v49 }
 0x48f   : > { %2982 = vmatmul.msk.f32.gmra.mxu1 %vm5487_vm10, %v4754_v60 }
 0x491   : > { %v2529_v46 = vpop.f32.mrf.mxu2  ;;  %2974 = vmatmul.msk.f32.gmra.mxu0 %vm5488_vm6, %v4754_v60 }
 0x492   : > { %2597 = vst [vmem:[%s5091_s23 + $0x50] sm:$0xff] %v2529_v46 }
 0x493   : > { %v2444_v52 = vpop.f32.mrf.mxu0  ;;  %v2485_v35 = vpop.f32.mrf.mxu1 }
 0x494   : > { %2591 = vst [vmem:[%s5091_s23] sm:$0xff] %v2444_v52 }
 0x495   : > { %v2570_v58 = vpop.f32.mrf.mxu3  ;;  %2592 = vst [vmem:[%s5091_s23 + $0x8] sm:$0xff] %v2485_v35 }
 0x496   : > { %2598 = vst [vmem:[%s5091_s23 + $0x58] sm:$0xff] %v2570_v58 }
 0x49b   : > { %v2532_v57 = vpop.f32.mrf.mxu2  ;;  %v2447_v56 = vpop.f32.mrf.mxu0 }
 0x49c   : > { %v2488_v54 = vpop.f32.mrf.mxu1  ;;  %2601 = vst [vmem:[%s5091_s23 + $0x90] sm:$0xff] %v2532_v57 }
 0x49d   : > { %2595 = vst [vmem:[%s5091_s23 + $0x40] sm:$0xff] %v2447_v56  ;;  %v2573_v45 = vpop.f32.mrf.mxu3 }
 0x49e   : > { %2596 = vst [vmem:[%s5091_s23 + $0x48] sm:$0xff] %v2488_v54 }
 0x49f   : > { %2602 = vst [vmem:[%s5091_s23 + $0x98] sm:$0xff] %v2573_v45 }
 0x4a3   : > { %v2535_v60 = vpop.f32.mrf.mxu2  ;;  %v2450_v6 = vpop.f32.mrf.mxu0 }
 0x4a4   : > { %v2491_v43 = vpop.f32.mrf.mxu1  ;;  %2605 = vst [vmem:[%s5091_s23 + $0xd0] sm:$0xff] %v2535_v60 }
 0x4a5   : > { %2599 = vst [vmem:[%s5091_s23 + $0x80] sm:$0xff] %v2450_v6  ;;  %v2576_v53 = vpop.f32.mrf.mxu3 }
 0x4a6   : > { %2600 = vst [vmem:[%s5091_s23 + $0x88] sm:$0xff] %v2491_v43 }
 0x4a7   : > { %2606 = vst [vmem:[%s5091_s23 + $0xd8] sm:$0xff] %v2576_v53 }
 0x4ab   : > { %v2538_v21 = vpop.f32.mrf.mxu2  ;;  %v2453_v7 = vpop.f32.mrf.mxu0 }
 0x4ac   : > { %v2494_v5 = vpop.f32.mrf.mxu1  ;;  %2609 = vst [vmem:[%s5091_s23 + $0x110] sm:$0xff] %v2538_v21 }
 0x4ad   : > { %2603 = vst [vmem:[%s5091_s23 + $0xc0] sm:$0xff] %v2453_v7  ;;  %v2579_v1 = vpop.f32.mrf.mxu3 }
 0x4ae   : > { %2604 = vst [vmem:[%s5091_s23 + $0xc8] sm:$0xff] %v2494_v5 }
 0x4af   : > { %2610 = vst [vmem:[%s5091_s23 + $0x118] sm:$0xff] %v2579_v1 }
 0x4b3   : > { %v2541_v3 = vpop.f32.mrf.mxu2 }
 0x4b4   : > { %v2497_v51 = vpop.f32.mrf.mxu1  ;;  %v2456_v15 = vpop.f32.mrf.mxu0  ;;  %2613 = vst [vmem:[%s5091_s23 + $0x150] sm:$0xff] %v2541_v3 }
 0x4b5   : > { %2608 = vst [vmem:[%s5091_s23 + $0x108] sm:$0xff] %v2497_v51  ;;  %v2582_v28 = vpop.f32.mrf.mxu3 }
 0x4b6   : > { %2607 = vst [vmem:[%s5091_s23 + $0x100] sm:$0xff] %v2456_v15 }
 0x4b7   : > { %2614 = vst [vmem:[%s5091_s23 + $0x158] sm:$0xff] %v2582_v28 }
 0x4bc   : > { %v2500_v62 = vpop.f32.mrf.mxu1 }
 0x4bd   : > { %2612 = vst [vmem:[%s5091_s23 + $0x148] sm:$0xff] %v2500_v62  ;;  %v2459_v12 = vpop.f32.mrf.mxu0  ;;  %v2544_v17 = vpop.f32.mrf.mxu2 }
 0x4be   : > { %2611 = vst [vmem:[%s5091_s23 + $0x140] sm:$0xff] %v2459_v12 }
 0x4bf   : > { %2617 = vst [vmem:[%s5091_s23 + $0x190] sm:$0xff] %v2544_v17 }
 0x4c4   : > { %v2585_v63 = vpop.f32.mrf.mxu3  ;;  %v2503_v36 = vpop.f32.mrf.mxu1 }
 0x4c5   : > { %2618 = vst [vmem:[%s5091_s23 + $0x198] sm:$0xff] %v2585_v63  ;;  %v2547_v10 = vpop.f32.mrf.mxu2 }
 0x4c6   : > { %v2462_v2 = vpop.f32.mrf.mxu0  ;;  %2616 = vst [vmem:[%s5091_s23 + $0x188] sm:$0xff] %v2503_v36 }
 0x4c7   : > { %2615 = vst [vmem:[%s5091_s23 + $0x180] sm:$0xff] %v2462_v2 }
 0x4c8   : > { %2621 = vst [vmem:[%s5091_s23 + $0x1d0] sm:$0xff] %v2547_v10 }
 0x4cc   : > { %v2588_v47 = vpop.f32.mrf.mxu3  ;;  %v2506_v41 = vpop.f32.mrf.mxu1 }
 0x4cd   : > { %2622 = vst [vmem:[%s5091_s23 + $0x1d8] sm:$0xff] %v2588_v47  ;;  %v2758_v14 = vpop.f32.mrf.mxu2 }
 0x4ce   : > { %v2465_v18 = vpop.f32.mrf.mxu0  ;;  %2620 = vst [vmem:[%s5091_s23 + $0x1c8] sm:$0xff] %v2506_v41 }
 0x4cf   : > { %2619 = vst [vmem:[%s5091_s23 + $0x1c0] sm:$0xff] %v2465_v18 }
 0x4d0   : > { %2825 = vst [vmem:[%s5091_s23 + $0x30] sm:$0xff] %v2758_v14 }
 0x4d4   : > { %v2799_v25 = vpop.f32.mrf.mxu3  ;;  %v2717_v22 = vpop.f32.mrf.mxu1 }
 0x4d5   : > { %2826 = vst [vmem:[%s5091_s23 + $0x38] sm:$0xff] %v2799_v25  ;;  %v2761_v13 = vpop.f32.mrf.mxu2 }
 0x4d6   : > { %v2676_v23 = vpop.f32.mrf.mxu0  ;;  %2824 = vst [vmem:[%s5091_s23 + $0x28] sm:$0xff] %v2717_v22 }
 0x4d7   : > { %2823 = vst [vmem:[%s5091_s23 + $0x20] sm:$0xff] %v2676_v23 }
 0x4d8   : > { %2829 = vst [vmem:[%s5091_s23 + $0x70] sm:$0xff] %v2761_v13 }
 0x4dc   : > { %v2802_v59 = vpop.f32.mrf.mxu3  ;;  %v2720_v0 = vpop.f32.mrf.mxu1 }
 0x4dd   : > { %2830 = vst [vmem:[%s5091_s23 + $0x78] sm:$0xff] %v2802_v59  ;;  %v2764_v32 = vpop.f32.mrf.mxu2 }
 0x4de   : > { %v2679_v11 = vpop.f32.mrf.mxu0  ;;  %2828 = vst [vmem:[%s5091_s23 + $0x68] sm:$0xff] %v2720_v0 }
 0x4df   : > { %2827 = vst [vmem:[%s5091_s23 + $0x60] sm:$0xff] %v2679_v11 }
 0x4e0   : > { %2833 = vst [vmem:[%s5091_s23 + $0xb0] sm:$0xff] %v2764_v32 }
 0x4e4   : > { %v2805_v61 = vpop.f32.mrf.mxu3  ;;  %v2723_v44 = vpop.f32.mrf.mxu1 }
 0x4e5   : > { %2834 = vst [vmem:[%s5091_s23 + $0xb8] sm:$0xff] %v2805_v61  ;;  %v2767_v34 = vpop.f32.mrf.mxu2 }
 0x4e6   : > { %v2682_v20 = vpop.f32.mrf.mxu0  ;;  %2832 = vst [vmem:[%s5091_s23 + $0xa8] sm:$0xff] %v2723_v44 }
 0x4e7   : > { %2831 = vst [vmem:[%s5091_s23 + $0xa0] sm:$0xff] %v2682_v20 }
 0x4e8   : > { %2837 = vst [vmem:[%s5091_s23 + $0xf0] sm:$0xff] %v2767_v34 }
 0x4ec   : > { %v2808_v48 = vpop.f32.mrf.mxu3  ;;  %v2726_v9 = vpop.f32.mrf.mxu1 }
 0x4ed   : > { %2838 = vst [vmem:[%s5091_s23 + $0xf8] sm:$0xff] %v2808_v48  ;;  %v2770_v38 = vpop.f32.mrf.mxu2 }
 0x4ee   : > { %v2685_v50 = vpop.f32.mrf.mxu0  ;;  %2836 = vst [vmem:[%s5091_s23 + $0xe8] sm:$0xff] %v2726_v9 }
 0x4ef   : > { %2835 = vst [vmem:[%s5091_s23 + $0xe0] sm:$0xff] %v2685_v50 }
 0x4f0   : > { %2841 = vst [vmem:[%s5091_s23 + $0x130] sm:$0xff] %v2770_v38 }
 0x4f4   : > { %v2811_v8 = vpop.f32.mrf.mxu3  ;;  %v2729_v27 = vpop.f32.mrf.mxu1 }
 0x4f5   : > { %2842 = vst [vmem:[%s5091_s23 + $0x138] sm:$0xff] %v2811_v8  ;;  %v2773_v55 = vpop.f32.mrf.mxu2 }
 0x4f6   : > { %v2688_v30 = vpop.f32.mrf.mxu0  ;;  %2840 = vst [vmem:[%s5091_s23 + $0x128] sm:$0xff] %v2729_v27 }
 0x4f7   : > { %2839 = vst [vmem:[%s5091_s23 + $0x120] sm:$0xff] %v2688_v30 }
 0x4f8   : > { %2845 = vst [vmem:[%s5091_s23 + $0x170] sm:$0xff] %v2773_v55 }
 0x4fc   : > { %v2814_v31 = vpop.f32.mrf.mxu3  ;;  %v2732_v39 = vpop.f32.mrf.mxu1 }
 0x4fd   : > { %2846 = vst [vmem:[%s5091_s23 + $0x178] sm:$0xff] %v2814_v31  ;;  %v2776_v4 = vpop.f32.mrf.mxu2 }
 0x4fe   : > { %v2691_v24 = vpop.f32.mrf.mxu0  ;;  %2844 = vst [vmem:[%s5091_s23 + $0x168] sm:$0xff] %v2732_v39 }
 0x4ff   : > { %2843 = vst [vmem:[%s5091_s23 + $0x160] sm:$0xff] %v2691_v24 }
 0x500   : > { %2849 = vst [vmem:[%s5091_s23 + $0x1b0] sm:$0xff] %v2776_v4 }
 0x504   : > { %v2817_v40 = vpop.f32.mrf.mxu3  ;;  %v2735_v33 = vpop.f32.mrf.mxu1 }
 0x505   : > { %2850 = vst [vmem:[%s5091_s23 + $0x1b8] sm:$0xff] %v2817_v40  ;;  %v2779_v29 = vpop.f32.mrf.mxu2 }
 0x506   : > { %v2694_v26 = vpop.f32.mrf.mxu0  ;;  %2848 = vst [vmem:[%s5091_s23 + $0x1a8] sm:$0xff] %v2735_v33 }
 0x507   : > { %2847 = vst [vmem:[%s5091_s23 + $0x1a0] sm:$0xff] %v2694_v26 }
 0x508   : > { %2853 = vst [vmem:[%s5091_s23 + $0x1f0] sm:$0xff] %v2779_v29 }
 0x50c   : > { %v2820_v37 = vpop.f32.mrf.mxu3  ;;  %v2738_v19 = vpop.f32.mrf.mxu1 }
 0x50d   : > { %2854 = vst [vmem:[%s5091_s23 + $0x1f8] sm:$0xff] %v2820_v37 }
 0x50e   : > { %v2697_v42 = vpop.f32.mrf.mxu0  ;;  %2852 = vst [vmem:[%s5091_s23 + $0x1e8] sm:$0xff] %v2738_v19 }
 0x50f   : > { %2851 = vst [vmem:[%s5091_s23 + $0x1e0] sm:$0xff] %v2697_v42 }
 0x510 PF: > { %s11_s6 = sadd.s32 1, %s3498_s6  }
 0x511   : > { %p8_p4 = scmp.ge.s32.totalorder %s11_s6, 4  }
 0x513   :  { %10 = sbr.rel (!%p8_p4) target bundleno = 1 (0x1), region = 57 }

</bundles_post_ra>
